<compile_context>
chip_gen: v7x
topology: tpu7x:2x2x1
jax: 0.10.0
libtpu: 0.0.40
codegen_flags: <defaults>
</compile_context>

<pallas_src>
import math
from functools import partial

import jax
import jax.numpy as jnp
from jax import lax
from jax.experimental import pallas as pl
from jax.experimental.pallas import tpu as pltpu


def _derive_vmem_limit(frac=0.6, fallback=32 * 1024 * 1024):
    """VMEM limit derived from the actual chip (64 MiB/TC on v7x, 128 on v5e/v6e)."""
    try:
        info = pltpu.get_tpu_info()
        cap = getattr(info, "vmem_capacity_bytes", None)
        if cap:
            return int(cap * frac)
    except Exception:
        pass
    return fallback


_VMEM_LIMIT = _derive_vmem_limit()


# ---------------------------------------------------------------------------
# Fused per-layer kernel: one batch element per grid step, everything in VMEM.
# ---------------------------------------------------------------------------
def _layer_kernel(x_ref, pe_ref, w1_ref, s1_ref, win_ref, bin_ref,
                  wf_ref, bf_ref, g_ref, be_ref, o_ref, *, nhead, scale, eps):
    x = x_ref[...].astype(jnp.float32)                                   # (L, C) residual
    C = x.shape[-1]
    dh = C // nhead

    # --- PE add + cnn_block1 (folded BN) + ReLU -----------------------------
    h = x + pe_ref[...].astype(jnp.float32)
    h = jnp.dot(h.astype(jnp.bfloat16), w1_ref[...],
                preferred_element_type=jnp.float32)
    h = jnp.maximum(h + s1_ref[...], 0.0)                                # (L, C)

    # --- QKV in-projection ---------------------------------------------------
    qkv = jnp.dot(h.astype(jnp.bfloat16), win_ref[...],
                  preferred_element_type=jnp.float32) + bin_ref[...]     # (L, 3C) f32
    q = qkv[:, :C].astype(jnp.bfloat16)
    k = qkv[:, C:2 * C].astype(jnp.bfloat16)
    v = qkv[:, 2 * C:].astype(jnp.bfloat16)

    # --- multi-head attention (static unroll over heads, lane slices) -------
    heads = []
    for hi in range(nhead):
        lo, hiidx = hi * dh, (hi + 1) * dh
        qh = q[:, lo:hiidx]                                              # (L, dh)
        kh = k[:, lo:hiidx]
        vh = v[:, lo:hiidx]
        s = lax.dot_general(qh, kh, (((1,), (1,)), ((), ())),
                            preferred_element_type=jnp.float32) * scale  # (L, L)
        m = jnp.max(s, axis=-1, keepdims=True)
        p = jnp.exp(s - m)
        denom = jnp.sum(p, axis=-1, keepdims=True)
        p = p * pl.reciprocal(denom, approx=True)                        # EUP slot
        heads.append(jnp.dot(p.astype(jnp.bfloat16), vh,
                             preferred_element_type=jnp.float32))        # (L, dh)
    attn = jnp.concatenate(heads, axis=-1)                               # (L, C) f32

    # --- out_proj folded into cnn_block2 (folded BN) + ReLU ------------------
    t = jnp.dot(attn.astype(jnp.bfloat16), wf_ref[...],
                preferred_element_type=jnp.float32)
    t = jnp.maximum(t + bf_ref[...], 0.0)                                # (L, C)

    # --- residual + LayerNorm (f32 stats) ------------------------------------
    y = t + x
    mean = jnp.mean(y, axis=-1, keepdims=True)
    yc = y - mean
    var = jnp.mean(yc * yc, axis=-1, keepdims=True)
    yn = yc * lax.rsqrt(var + eps)
    o_ref[...] = (yn * g_ref[...] + be_ref[...]).astype(o_ref.dtype)     # lane-dense store


def encoder_layer(x, p, nhead, eps=1e-5):
    """x: (B, L, C) bf16 -> (B, L, C) bf16. One fused kernel per layer."""
    B, L, C = x.shape
    dh = C // nhead
    scale = 1.0 / math.sqrt(dh)
    rep = lambda b: (0, 0)

    return pl.pallas_call(
        partial(_layer_kernel, nhead=nhead, scale=scale, eps=eps),
        out_shape=jax.ShapeDtypeStruct((B, L, C), x.dtype),
        grid_spec=pltpu.PrefetchScalarGridSpec(
            num_scalar_prefetch=0,
            grid=(B,),
            in_specs=[
                pl.BlockSpec((None, L, C), lambda b: (b, 0, 0)),      # x (residual)
                pl.BlockSpec((L, C), rep),                             # pe
                pl.BlockSpec((C, C), rep),                             # w1 (BN folded)
                pl.BlockSpec((1, C), rep),                             # s1
                pl.BlockSpec((C, 3 * C), rep),                         # w_in
                pl.BlockSpec((1, 3 * C), rep),                         # b_in
                pl.BlockSpec((C, C), rep),                             # w_fold (=w_out@w2')
                pl.BlockSpec((1, C), rep),                             # b_fold
                pl.BlockSpec((1, C), rep),                             # ln_gamma
                pl.BlockSpec((1, C), rep),                             # ln_beta
            ],
            out_specs=pl.BlockSpec((None, L, C), lambda b: (b, 0, 0)),
        ),
        compiler_params=pltpu.CompilerParams(
            dimension_semantics=("parallel",),                          # dual-TC on v7x
            vmem_limit_bytes=_VMEM_LIMIT),
    )(x, p["pe"], p["w1"], p["s1"], p["w_in"], p["b_in"],
      p["w_fold"], p["b_fold"], p["ln_gamma"], p["ln_beta"])


# ---------------------------------------------------------------------------
# Parameters & constants (plain-JAX prep; BN + out_proj folded once, in f32)
# ---------------------------------------------------------------------------
def make_pe_2d(d_model, height, width):
    # Matches PositionalEncoding2D: channels interleaved [sin_y, cos_y, sin_x, cos_x]
    # per frequency (pe[0::4], pe[1::4], pe[2::4], pe[3::4]).
    assert d_model % 4 == 0
    y_pos = jnp.tile(jnp.arange(height, dtype=jnp.float32)[:, None], (1, width))
    x_pos = jnp.tile(jnp.arange(width, dtype=jnp.float32)[None, :], (height, 1))
    div_term = jnp.exp(jnp.arange(0, d_model // 2, 2, dtype=jnp.float32)
                       * -(math.log(10000.0) / (d_model // 2)))          # (d_model//4,)
    d = div_term[:, None, None]
    sy = jnp.sin(y_pos[None] * d)
    cy = jnp.cos(y_pos[None] * d)
    sx = jnp.sin(x_pos[None] * d)
    cx = jnp.cos(x_pos[None] * d)
    pe = jnp.stack([sy, cy, sx, cx], axis=1).reshape(d_model, height, width)
    return jnp.transpose(pe, (1, 2, 0))                                  # (H, W, C)


def _fold_bn(gamma, beta, mean, var, eps=1e-5):
    scale = gamma / jnp.sqrt(var + eps)
    shift = beta - mean * scale
    return scale, shift


def init_encoder_params(key, d_model, nhead, height, width, num_layers):
    C = d_model
    L = height * width
    pe = make_pe_2d(d_model, height, width).reshape(L, C).astype(jnp.bfloat16)
    params = []
    for _ in range(num_layers):
        key, sub = jax.random.split(key)
        ks = jax.random.split(sub, 18)
        nrm = lambda k, shape, s=0.05: jax.random.normal(k, shape, jnp.float32) * s
        # cnn_block1: conv1x1 (stored (C_in, C_out), i.e. x @ W) + BN running stats
        w1, b1 = nrm(ks[0], (C, C)), nrm(ks[1], (C,))
        sc1, sh1 = _fold_bn(1.0 + nrm(ks[2], (C,)), nrm(ks[3], (C,)),
                            nrm(ks[4], (C,)), 1.0 + jnp.abs(nrm(ks[5], (C,))))
        # MultiheadAttention in/out projections (stored transposed: x @ W)
        w_in, b_in = nrm(ks[6], (C, 3 * C)), nrm(ks[7], (3 * C,))
        w_out, b_out = nrm(ks[8], (C, C)), nrm(ks[9], (C,))
        # cnn_block2 + BN running stats
        w2, b2 = nrm(ks[10], (C, C)), nrm(ks[11], (C,))
        sc2, sh2 = _fold_bn(1.0 + nrm(ks[12], (C,)), nrm(ks[13], (C,)),
                            nrm(ks[14], (C,)), 1.0 + jnp.abs(nrm(ks[15], (C,))))

        # Fold BN1 into w1 / bias.
        w1f = w1 * sc1[None, :]
        s1 = b1 * sc1 + sh1
        # Fold BN2 into w2, then fold the attention out-projection into it (f32).
        w2s = w2 * sc2[None, :]
        s2 = b2 * sc2 + sh2
        w_fold = w_out @ w2s                       # (C, C) f32
        b_fold = b_out @ w2s + s2                  # (C,)  f32

        params.append({
            "pe": pe,
            "w1": w1f.astype(jnp.bfloat16),
            "s1": s1.reshape(1, C),
            "w_in": w_in.astype(jnp.bfloat16),
            "b_in": b_in.reshape(1, 3 * C),
            "w_fold": w_fold.astype(jnp.bfloat16),
            "b_fold": b_fold.reshape(1, C),
            "ln_gamma": (1.0 + nrm(ks[16], (C,))).reshape(1, C),
            "ln_beta": nrm(ks[17], (C,)).reshape(1, C),
        })
    return params


# ---------------------------------------------------------------------------
# Forward pass
# ---------------------------------------------------------------------------
def encoder_forward(x_nchw, params, nhead):
    B, C, H, W = x_nchw.shape
    # NCHW -> (B, L, C) with l = h*W + w (matches torch's permute/reshape);
    # inter-layer activations kept in bf16 (f32 stats inside the kernel).
    x = jnp.transpose(x_nchw, (0, 2, 3, 1)).reshape(B, H * W, C).astype(jnp.bfloat16)
    for p in params:
        x = encoder_layer(x, p, nhead)
    x = x.astype(jnp.float32)
    return jnp.transpose(x.reshape(B, H, W, C), (0, 3, 1, 2))            # -> NCHW


# ---------------------------------------------------------------------------
if __name__ == "__main__":
    # Small shapes consistent with the module: d_model % 4 == 0, d_model % nhead == 0.
    # d_model=128 keeps every matmul / HBM store lane-dense.
    d_model, nhead, height, width, num_layers = 128, 4, 4, 8, 2
    batch = 2

    key = jax.random.PRNGKey(0)
    kparam, kx = jax.random.split(key)
    params = init_encoder_params(kparam, d_model, nhead, height, width, num_layers)
    x = jax.random.normal(kx, (batch, d_model, height, width), jnp.float32)  # NCHW

    fwd = jax.jit(partial(encoder_forward, nhead=nhead))
    out = jax.block_until_ready(fwd(x, params))

    assert out.shape == (batch, d_model, height, width), out.shape
    assert bool(jnp.all(jnp.isfinite(out)))
    print("KERNEL_OK")
</pallas_src>

<mosaic_0001>
module attributes {stable_mosaic.version = 11 : i64} {
  func.func @_layer_kernel(%arg0: i32, %arg1: memref<1x32x128xbf16, #tpu.memory_space<vmem>>, %arg2: memref<32x128xbf16, #tpu.memory_space<vmem>>, %arg3: memref<128x128xbf16, #tpu.memory_space<vmem>>, %arg4: memref<1x128xf32, #tpu.memory_space<vmem>>, %arg5: memref<128x384xbf16, #tpu.memory_space<vmem>>, %arg6: memref<1x384xf32, #tpu.memory_space<vmem>>, %arg7: memref<128x128xbf16, #tpu.memory_space<vmem>>, %arg8: memref<1x128xf32, #tpu.memory_space<vmem>>, %arg9: memref<1x128xf32, #tpu.memory_space<vmem>>, %arg10: memref<1x128xf32, #tpu.memory_space<vmem>>, %arg11: memref<1x32x128xbf16, #tpu.memory_space<vmem>>) attributes {dimension_semantics = [#tpu.dimension_semantics<parallel>], iteration_bounds = array<i64: 2>, scalar_prefetch = 0 : i64, scratch_operands = 0 : i64, tpu.core_type = #tpu.core_type<tc>, window_params = [{transform_indices = @transform_0, window_bounds = array<i64: 1, 32, 128>}, {pipeline_mode = #tpu.pipeline_mode<synchronous>, transform_indices = @transform_1, window_bounds = array<i64: 32, 128>}, {pipeline_mode = #tpu.pipeline_mode<synchronous>, transform_indices = @transform_2, window_bounds = array<i64: 128, 128>}, {pipeline_mode = #tpu.pipeline_mode<synchronous>, transform_indices = @transform_3, window_bounds = array<i64: 1, 128>}, {pipeline_mode = #tpu.pipeline_mode<synchronous>, transform_indices = @transform_4, window_bounds = array<i64: 128, 384>}, {pipeline_mode = #tpu.pipeline_mode<synchronous>, transform_indices = @transform_5, window_bounds = array<i64: 1, 384>}, {pipeline_mode = #tpu.pipeline_mode<synchronous>, transform_indices = @transform_6, window_bounds = array<i64: 128, 128>}, {pipeline_mode = #tpu.pipeline_mode<synchronous>, transform_indices = @transform_7, window_bounds = array<i64: 1, 128>}, {pipeline_mode = #tpu.pipeline_mode<synchronous>, transform_indices = @transform_8, window_bounds = array<i64: 1, 128>}, {pipeline_mode = #tpu.pipeline_mode<synchronous>, transform_indices = @transform_9, window_bounds = array<i64: 1, 128>}, {transform_indices = @transform_10, window_bounds = array<i64: 1, 32, 128>}]} {
    %c0 = arith.constant 0 : index
    %c0_0 = arith.constant 0 : index
    %c0_1 = arith.constant 0 : index
    %0 = vector.load %arg1[%c0, %c0_0, %c0_1] : memref<1x32x128xbf16, #tpu.memory_space<vmem>>, vector<1x32x128xbf16>
    %1 = vector.shape_cast %0 : vector<1x32x128xbf16> to vector<32x128xbf16>
    %2 = arith.extf %1 : vector<32x128xbf16> to vector<32x128xf32>
    %c0_2 = arith.constant 0 : index
    %c0_3 = arith.constant 0 : index
    %3 = vector.load %arg2[%c0_2, %c0_3] : memref<32x128xbf16, #tpu.memory_space<vmem>>, vector<32x128xbf16>
    %4 = arith.extf %3 : vector<32x128xbf16> to vector<32x128xf32>
    %5 = arith.addf %2, %4 : vector<32x128xf32>
    %6 = arith.truncf %5 : vector<32x128xf32> to vector<32x128xbf16>
    %c0_4 = arith.constant 0 : index
    %c0_5 = arith.constant 0 : index
    %7 = vector.load %arg3[%c0_4, %c0_5] : memref<128x128xbf16, #tpu.memory_space<vmem>>, vector<128x128xbf16>
    %cst = arith.constant dense<0.000000e+00> : vector<32x128xf32>
    %8 = tpu.matmul %6, %7, %cst {dimension_numbers = #tpu.dot_dimension_numbers<[1], [0], [0], [1], [0, 0, 1, 1], [], []>} : vector<32x128xbf16>, vector<128x128xbf16>, vector<32x128xf32> -> vector<32x128xf32>
    %c0_6 = arith.constant 0 : index
    %c0_7 = arith.constant 0 : index
    %9 = vector.load %arg4[%c0_6, %c0_7] : memref<1x128xf32, #tpu.memory_space<vmem>>, vector<1x128xf32>
    %10 = vector.broadcast %9 : vector<1x128xf32> to vector<32x128xf32>
    %11 = arith.addf %8, %10 : vector<32x128xf32>
    %cst_8 = arith.constant 0.000000e+00 : f32
    %12 = vector.broadcast %cst_8 : f32 to vector<32x128xf32>
    %13 = arith.maximumf %11, %12 : vector<32x128xf32>
    %14 = arith.truncf %13 : vector<32x128xf32> to vector<32x128xbf16>
    %c0_9 = arith.constant 0 : index
    %c0_10 = arith.constant 0 : index
    %15 = vector.load %arg5[%c0_9, %c0_10] : memref<128x384xbf16, #tpu.memory_space<vmem>>, vector<128x384xbf16>
    %cst_11 = arith.constant dense<0.000000e+00> : vector<32x384xf32>
    %16 = tpu.matmul %14, %15, %cst_11 {dimension_numbers = #tpu.dot_dimension_numbers<[1], [0], [0], [1], [0, 0, 1, 1], [], []>} : vector<32x128xbf16>, vector<128x384xbf16>, vector<32x384xf32> -> vector<32x384xf32>
    %c0_12 = arith.constant 0 : index
    %c0_13 = arith.constant 0 : index
    %17 = vector.load %arg6[%c0_12, %c0_13] : memref<1x384xf32, #tpu.memory_space<vmem>>, vector<1x384xf32>
    %18 = vector.broadcast %17 : vector<1x384xf32> to vector<32x384xf32>
    %19 = arith.addf %16, %18 : vector<32x384xf32>
    %20 = vector.extract_strided_slice %19 {offsets = [0, 0], sizes = [32, 128], strides = [1, 1]} : vector<32x384xf32> to vector<32x128xf32>
    %21 = arith.truncf %20 : vector<32x128xf32> to vector<32x128xbf16>
    %22 = vector.extract_strided_slice %19 {offsets = [0, 128], sizes = [32, 128], strides = [1, 1]} : vector<32x384xf32> to vector<32x128xf32>
    %23 = arith.truncf %22 : vector<32x128xf32> to vector<32x128xbf16>
    %24 = vector.extract_strided_slice %19 {offsets = [0, 256], sizes = [32, 128], strides = [1, 1]} : vector<32x384xf32> to vector<32x128xf32>
    %25 = arith.truncf %24 : vector<32x128xf32> to vector<32x128xbf16>
    %26 = vector.extract_strided_slice %21 {offsets = [0, 0], sizes = [32, 32], strides = [1, 1]} : vector<32x128xbf16> to vector<32x32xbf16>
    %27 = vector.extract_strided_slice %23 {offsets = [0, 0], sizes = [32, 32], strides = [1, 1]} : vector<32x128xbf16> to vector<32x32xbf16>
    %28 = vector.extract_strided_slice %25 {offsets = [0, 0], sizes = [32, 32], strides = [1, 1]} : vector<32x128xbf16> to vector<32x32xbf16>
    %cst_14 = arith.constant dense<0.000000e+00> : vector<32x32xf32>
    %29 = tpu.matmul %26, %27, %cst_14 {dimension_numbers = #tpu.dot_dimension_numbers<[1], [1], [0], [0], [0, 0, 1, 0], [], []>} : vector<32x32xbf16>, vector<32x32xbf16>, vector<32x32xf32> -> vector<32x32xf32>
    %cst_15 = arith.constant 0.176776692 : f32
    %30 = vector.broadcast %cst_15 : f32 to vector<32x32xf32>
    %31 = arith.mulf %29, %30 : vector<32x32xf32>
    %cst_16 = arith.constant dense<0xFF800000> : vector<32xf32>
    %32 = vector.multi_reduction <maximumf>, %31, %cst_16 [1] : vector<32x32xf32> to vector<32xf32>
    %33 = vector.shape_cast %32 : vector<32xf32> to vector<32x1xf32>
    %34 = vector.broadcast %33 : vector<32x1xf32> to vector<32x32xf32>
    %35 = arith.subf %31, %34 : vector<32x32xf32>
    %36 = math.exp %35 : vector<32x32xf32>
    %cst_17 = arith.constant dense<0.000000e+00> : vector<32xf32>
    %37 = vector.multi_reduction <add>, %36, %cst_17 [1] : vector<32x32xf32> to vector<32xf32>
    %38 = vector.shape_cast %37 : vector<32xf32> to vector<32x1xf32>
    %39 = tpu.reciprocal %38 {approx = true} : vector<32x1xf32> -> vector<32x1xf32>
    %40 = vector.broadcast %39 : vector<32x1xf32> to vector<32x32xf32>
    %41 = arith.mulf %36, %40 : vector<32x32xf32>
    %42 = arith.truncf %41 : vector<32x32xf32> to vector<32x32xbf16>
    %cst_18 = arith.constant dense<0.000000e+00> : vector<32x32xf32>
    %43 = tpu.matmul %42, %28, %cst_18 {dimension_numbers = #tpu.dot_dimension_numbers<[1], [0], [0], [1], [0, 0, 1, 1], [], []>} : vector<32x32xbf16>, vector<32x32xbf16>, vector<32x32xf32> -> vector<32x32xf32>
    %44 = vector.extract_strided_slice %21 {offsets = [0, 32], sizes = [32, 32], strides = [1, 1]} : vector<32x128xbf16> to vector<32x32xbf16>
    %45 = vector.extract_strided_slice %23 {offsets = [0, 32], sizes = [32, 32], strides = [1, 1]} : vector<32x128xbf16> to vector<32x32xbf16>
    %46 = vector.extract_strided_slice %25 {offsets = [0, 32], sizes = [32, 32], strides = [1, 1]} : vector<32x128xbf16> to vector<32x32xbf16>
    %cst_19 = arith.constant dense<0.000000e+00> : vector<32x32xf32>
    %47 = tpu.matmul %44, %45, %cst_19 {dimension_numbers = #tpu.dot_dimension_numbers<[1], [1], [0], [0], [0, 0, 1, 0], [], []>} : vector<32x32xbf16>, vector<32x32xbf16>, vector<32x32xf32> -> vector<32x32xf32>
    %cst_20 = arith.constant 0.176776692 : f32
    %48 = vector.broadcast %cst_20 : f32 to vector<32x32xf32>
    %49 = arith.mulf %47, %48 : vector<32x32xf32>
    %cst_21 = arith.constant dense<0xFF800000> : vector<32xf32>
    %50 = vector.multi_reduction <maximumf>, %49, %cst_21 [1] : vector<32x32xf32> to vector<32xf32>
    %51 = vector.shape_cast %50 : vector<32xf32> to vector<32x1xf32>
    %52 = vector.broadcast %51 : vector<32x1xf32> to vector<32x32xf32>
    %53 = arith.subf %49, %52 : vector<32x32xf32>
    %54 = math.exp %53 : vector<32x32xf32>
    %cst_22 = arith.constant dense<0.000000e+00> : vector<32xf32>
    %55 = vector.multi_reduction <add>, %54, %cst_22 [1] : vector<32x32xf32> to vector<32xf32>
    %56 = vector.shape_cast %55 : vector<32xf32> to vector<32x1xf32>
    %57 = tpu.reciprocal %56 {approx = true} : vector<32x1xf32> -> vector<32x1xf32>
    %58 = vector.broadcast %57 : vector<32x1xf32> to vector<32x32xf32>
    %59 = arith.mulf %54, %58 : vector<32x32xf32>
    %60 = arith.truncf %59 : vector<32x32xf32> to vector<32x32xbf16>
    %cst_23 = arith.constant dense<0.000000e+00> : vector<32x32xf32>
    %61 = tpu.matmul %60, %46, %cst_23 {dimension_numbers = #tpu.dot_dimension_numbers<[1], [0], [0], [1], [0, 0, 1, 1], [], []>} : vector<32x32xbf16>, vector<32x32xbf16>, vector<32x32xf32> -> vector<32x32xf32>
    %62 = vector.extract_strided_slice %21 {offsets = [0, 64], sizes = [32, 32], strides = [1, 1]} : vector<32x128xbf16> to vector<32x32xbf16>
    %63 = vector.extract_strided_slice %23 {offsets = [0, 64], sizes = [32, 32], strides = [1, 1]} : vector<32x128xbf16> to vector<32x32xbf16>
    %64 = vector.extract_strided_slice %25 {offsets = [0, 64], sizes = [32, 32], strides = [1, 1]} : vector<32x128xbf16> to vector<32x32xbf16>
    %cst_24 = arith.constant dense<0.000000e+00> : vector<32x32xf32>
    %65 = tpu.matmul %62, %63, %cst_24 {dimension_numbers = #tpu.dot_dimension_numbers<[1], [1], [0], [0], [0, 0, 1, 0], [], []>} : vector<32x32xbf16>, vector<32x32xbf16>, vector<32x32xf32> -> vector<32x32xf32>
    %cst_25 = arith.constant 0.176776692 : f32
    %66 = vector.broadcast %cst_25 : f32 to vector<32x32xf32>
    %67 = arith.mulf %65, %66 : vector<32x32xf32>
    %cst_26 = arith.constant dense<0xFF800000> : vector<32xf32>
    %68 = vector.multi_reduction <maximumf>, %67, %cst_26 [1] : vector<32x32xf32> to vector<32xf32>
    %69 = vector.shape_cast %68 : vector<32xf32> to vector<32x1xf32>
    %70 = vector.broadcast %69 : vector<32x1xf32> to vector<32x32xf32>
    %71 = arith.subf %67, %70 : vector<32x32xf32>
    %72 = math.exp %71 : vector<32x32xf32>
    %cst_27 = arith.constant dense<0.000000e+00> : vector<32xf32>
    %73 = vector.multi_reduction <add>, %72, %cst_27 [1] : vector<32x32xf32> to vector<32xf32>
    %74 = vector.shape_cast %73 : vector<32xf32> to vector<32x1xf32>
    %75 = tpu.reciprocal %74 {approx = true} : vector<32x1xf32> -> vector<32x1xf32>
    %76 = vector.broadcast %75 : vector<32x1xf32> to vector<32x32xf32>
    %77 = arith.mulf %72, %76 : vector<32x32xf32>
    %78 = arith.truncf %77 : vector<32x32xf32> to vector<32x32xbf16>
    %cst_28 = arith.constant dense<0.000000e+00> : vector<32x32xf32>
    %79 = tpu.matmul %78, %64, %cst_28 {dimension_numbers = #tpu.dot_dimension_numbers<[1], [0], [0], [1], [0, 0, 1, 1], [], []>} : vector<32x32xbf16>, vector<32x32xbf16>, vector<32x32xf32> -> vector<32x32xf32>
    %80 = vector.extract_strided_slice %21 {offsets = [0, 96], sizes = [32, 32], strides = [1, 1]} : vector<32x128xbf16> to vector<32x32xbf16>
    %81 = vector.extract_strided_slice %23 {offsets = [0, 96], sizes = [32, 32], strides = [1, 1]} : vector<32x128xbf16> to vector<32x32xbf16>
    %82 = vector.extract_strided_slice %25 {offsets = [0, 96], sizes = [32, 32], strides = [1, 1]} : vector<32x128xbf16> to vector<32x32xbf16>
    %cst_29 = arith.constant dense<0.000000e+00> : vector<32x32xf32>
    %83 = tpu.matmul %80, %81, %cst_29 {dimension_numbers = #tpu.dot_dimension_numbers<[1], [1], [0], [0], [0, 0, 1, 0], [], []>} : vector<32x32xbf16>, vector<32x32xbf16>, vector<32x32xf32> -> vector<32x32xf32>
    %cst_30 = arith.constant 0.176776692 : f32
    %84 = vector.broadcast %cst_30 : f32 to vector<32x32xf32>
    %85 = arith.mulf %83, %84 : vector<32x32xf32>
    %cst_31 = arith.constant dense<0xFF800000> : vector<32xf32>
    %86 = vector.multi_reduction <maximumf>, %85, %cst_31 [1] : vector<32x32xf32> to vector<32xf32>
    %87 = vector.shape_cast %86 : vector<32xf32> to vector<32x1xf32>
    %88 = vector.broadcast %87 : vector<32x1xf32> to vector<32x32xf32>
    %89 = arith.subf %85, %88 : vector<32x32xf32>
    %90 = math.exp %89 : vector<32x32xf32>
    %cst_32 = arith.constant dense<0.000000e+00> : vector<32xf32>
    %91 = vector.multi_reduction <add>, %90, %cst_32 [1] : vector<32x32xf32> to vector<32xf32>
    %92 = vector.shape_cast %91 : vector<32xf32> to vector<32x1xf32>
    %93 = tpu.reciprocal %92 {approx = true} : vector<32x1xf32> -> vector<32x1xf32>
    %94 = vector.broadcast %93 : vector<32x1xf32> to vector<32x32xf32>
    %95 = arith.mulf %90, %94 : vector<32x32xf32>
    %96 = arith.truncf %95 : vector<32x32xf32> to vector<32x32xbf16>
    %cst_33 = arith.constant dense<0.000000e+00> : vector<32x32xf32>
    %97 = tpu.matmul %96, %82, %cst_33 {dimension_numbers = #tpu.dot_dimension_numbers<[1], [0], [0], [1], [0, 0, 1, 1], [], []>} : vector<32x32xbf16>, vector<32x32xbf16>, vector<32x32xf32> -> vector<32x32xf32>
    %98 = tpu.concatenate %43, %61, %79, %97 in 1 : vector<32x32xf32>, vector<32x32xf32>, vector<32x32xf32>, vector<32x32xf32> -> vector<32x128xf32>
    %99 = arith.truncf %98 : vector<32x128xf32> to vector<32x128xbf16>
    %c0_34 = arith.constant 0 : index
    %c0_35 = arith.constant 0 : index
    %100 = vector.load %arg7[%c0_34, %c0_35] : memref<128x128xbf16, #tpu.memory_space<vmem>>, vector<128x128xbf16>
    %cst_36 = arith.constant dense<0.000000e+00> : vector<32x128xf32>
    %101 = tpu.matmul %99, %100, %cst_36 {dimension_numbers = #tpu.dot_dimension_numbers<[1], [0], [0], [1], [0, 0, 1, 1], [], []>} : vector<32x128xbf16>, vector<128x128xbf16>, vector<32x128xf32> -> vector<32x128xf32>
    %c0_37 = arith.constant 0 : index
    %c0_38 = arith.constant 0 : index
    %102 = vector.load %arg8[%c0_37, %c0_38] : memref<1x128xf32, #tpu.memory_space<vmem>>, vector<1x128xf32>
    %103 = vector.broadcast %102 : vector<1x128xf32> to vector<32x128xf32>
    %104 = arith.addf %101, %103 : vector<32x128xf32>
    %cst_39 = arith.constant 0.000000e+00 : f32
    %105 = vector.broadcast %cst_39 : f32 to vector<32x128xf32>
    %106 = arith.maximumf %104, %105 : vector<32x128xf32>
    %107 = arith.addf %106, %2 : vector<32x128xf32>
    %cst_40 = arith.constant dense<0.000000e+00> : vector<32xf32>
    %108 = vector.multi_reduction <add>, %107, %cst_40 [1] : vector<32x128xf32> to vector<32xf32>
    %109 = vector.shape_cast %108 : vector<32xf32> to vector<32x1xf32>
    %cst_41 = arith.constant 1.280000e+02 : f32
    %110 = vector.broadcast %cst_41 : f32 to vector<32x1xf32>
    %111 = arith.divf %109, %110 : vector<32x1xf32>
    %112 = vector.broadcast %111 : vector<32x1xf32> to vector<32x128xf32>
    %113 = arith.subf %107, %112 : vector<32x128xf32>
    %114 = arith.mulf %113, %113 : vector<32x128xf32>
    %cst_42 = arith.constant dense<0.000000e+00> : vector<32xf32>
    %115 = vector.multi_reduction <add>, %114, %cst_42 [1] : vector<32x128xf32> to vector<32xf32>
    %116 = vector.shape_cast %115 : vector<32xf32> to vector<32x1xf32>
    %cst_43 = arith.constant 1.280000e+02 : f32
    %117 = vector.broadcast %cst_43 : f32 to vector<32x1xf32>
    %118 = arith.divf %116, %117 : vector<32x1xf32>
    %cst_44 = arith.constant 9.99999974E-6 : f32
    %119 = vector.broadcast %cst_44 : f32 to vector<32x1xf32>
    %120 = arith.addf %118, %119 : vector<32x1xf32>
    %121 = math.rsqrt %120 : vector<32x1xf32>
    %122 = vector.broadcast %121 : vector<32x1xf32> to vector<32x128xf32>
    %123 = arith.mulf %113, %122 : vector<32x128xf32>
    %c0_45 = arith.constant 0 : index
    %c0_46 = arith.constant 0 : index
    %124 = vector.load %arg9[%c0_45, %c0_46] : memref<1x128xf32, #tpu.memory_space<vmem>>, vector<1x128xf32>
    %125 = vector.broadcast %124 : vector<1x128xf32> to vector<32x128xf32>
    %126 = arith.mulf %123, %125 : vector<32x128xf32>
    %c0_47 = arith.constant 0 : index
    %c0_48 = arith.constant 0 : index
    %127 = vector.load %arg10[%c0_47, %c0_48] : memref<1x128xf32, #tpu.memory_space<vmem>>, vector<1x128xf32>
    %128 = vector.broadcast %127 : vector<1x128xf32> to vector<32x128xf32>
    %129 = arith.addf %126, %128 : vector<32x128xf32>
    %130 = arith.truncf %129 : vector<32x128xf32> to vector<32x128xbf16>
    %c0_49 = arith.constant 0 : index
    %c0_50 = arith.constant 0 : index
    %c0_51 = arith.constant 0 : index
    %131 = vector.load %arg11[%c0_49, %c0_50, %c0_51] : memref<1x32x128xbf16, #tpu.memory_space<vmem>>, vector<1x32x128xbf16>
    %132 = vector.shape_cast %131 : vector<1x32x128xbf16> to vector<32x128xbf16>
    %133 = vector.shape_cast %130 : vector<32x128xbf16> to vector<1x32x128xbf16>
    tpu.vector_store %arg11[%c0_49, %c0_50, %c0_51], %133 {strides = array<i32>} : memref<1x32x128xbf16, #tpu.memory_space<vmem>>, vector<1x32x128xbf16>,
    return
  }
  func.func @transform_0(%arg0: i32) -> (i32, i32, i32) {
    %c0_i32 = arith.constant 0 : i32
    %c0_i32_0 = arith.constant 0 : i32
    %c0_i32_1 = arith.constant 0 : i32
    return %arg0, %c0_i32, %c0_i32_0 : i32, i32, i32
  }
  func.func @transform_1(%arg0: i32) -> (i32, i32) {
    %c0_i32 = arith.constant 0 : i32
    %c0_i32_0 = arith.constant 0 : i32
    %c0_i32_1 = arith.constant 0 : i32
    return %c0_i32, %c0_i32_0 : i32, i32
  }
  func.func @transform_2(%arg0: i32) -> (i32, i32) {
    %c0_i32 = arith.constant 0 : i32
    %c0_i32_0 = arith.constant 0 : i32
    %c0_i32_1 = arith.constant 0 : i32
    return %c0_i32, %c0_i32_0 : i32, i32
  }
  func.func @transform_3(%arg0: i32) -> (i32, i32) {
    %c0_i32 = arith.constant 0 : i32
    %c0_i32_0 = arith.constant 0 : i32
    %c0_i32_1 = arith.constant 0 : i32
    return %c0_i32, %c0_i32_0 : i32, i32
  }
  func.func @transform_4(%arg0: i32) -> (i32, i32) {
    %c0_i32 = arith.constant 0 : i32
    %c0_i32_0 = arith.constant 0 : i32
    %c0_i32_1 = arith.constant 0 : i32
    return %c0_i32, %c0_i32_0 : i32, i32
  }
  func.func @transform_5(%arg0: i32) -> (i32, i32) {
    %c0_i32 = arith.constant 0 : i32
    %c0_i32_0 = arith.constant 0 : i32
    %c0_i32_1 = arith.constant 0 : i32
    return %c0_i32, %c0_i32_0 : i32, i32
  }
  func.func @transform_6(%arg0: i32) -> (i32, i32) {
    %c0_i32 = arith.constant 0 : i32
    %c0_i32_0 = arith.constant 0 : i32
    %c0_i32_1 = arith.constant 0 : i32
    return %c0_i32, %c0_i32_0 : i32, i32
  }
  func.func @transform_7(%arg0: i32) -> (i32, i32) {
    %c0_i32 = arith.constant 0 : i32
    %c0_i32_0 = arith.constant 0 : i32
    %c0_i32_1 = arith.constant 0 : i32
    return %c0_i32, %c0_i32_0 : i32, i32
  }
  func.func @transform_8(%arg0: i32) -> (i32, i32) {
    %c0_i32 = arith.constant 0 : i32
    %c0_i32_0 = arith.constant 0 : i32
    %c0_i32_1 = arith.constant 0 : i32
    return %c0_i32, %c0_i32_0 : i32, i32
  }
  func.func @transform_9(%arg0: i32) -> (i32, i32) {
    %c0_i32 = arith.constant 0 : i32
    %c0_i32_0 = arith.constant 0 : i32
    %c0_i32_1 = arith.constant 0 : i32
    return %c0_i32, %c0_i32_0 : i32, i32
  }
  func.func @transform_10(%arg0: i32) -> (i32, i32, i32) {
    %c0_i32 = arith.constant 0 : i32
    %c0_i32_0 = arith.constant 0 : i32
    %c0_i32_1 = arith.constant 0 : i32
    return %arg0, %c0_i32, %c0_i32_0 : i32, i32, i32
  }
}

module attributes {stable_mosaic.version = 11 : i64} {
  func.func @_layer_kernel(%arg0: i32, %arg1: memref<1x32x128xbf16, #tpu.memory_space<vmem>>, %arg2: memref<32x128xbf16, #tpu.memory_space<vmem>>, %arg3: memref<128x128xbf16, #tpu.memory_space<vmem>>, %arg4: memref<1x128xf32, #tpu.memory_space<vmem>>, %arg5: memref<128x384xbf16, #tpu.memory_space<vmem>>, %arg6: memref<1x384xf32, #tpu.memory_space<vmem>>, %arg7: memref<128x128xbf16, #tpu.memory_space<vmem>>, %arg8: memref<1x128xf32, #tpu.memory_space<vmem>>, %arg9: memref<1x128xf32, #tpu.memory_space<vmem>>, %arg10: memref<1x128xf32, #tpu.memory_space<vmem>>, %arg11: memref<1x32x128xbf16, #tpu.memory_space<vmem>>) attributes {dimension_semantics = [#tpu.dimension_semantics<parallel>], iteration_bounds = array<i64: 2>, scalar_prefetch = 0 : i64, scratch_operands = 0 : i64, tpu.core_type = #tpu.core_type<tc>, window_params = [{transform_indices = @transform_0, window_bounds = array<i64: 1, 32, 128>}, {pipeline_mode = #tpu.pipeline_mode<synchronous>, transform_indices = @transform_1, window_bounds = array<i64: 32, 128>}, {pipeline_mode = #tpu.pipeline_mode<synchronous>, transform_indices = @transform_2, window_bounds = array<i64: 128, 128>}, {pipeline_mode = #tpu.pipeline_mode<synchronous>, transform_indices = @transform_3, window_bounds = array<i64: 1, 128>}, {pipeline_mode = #tpu.pipeline_mode<synchronous>, transform_indices = @transform_4, window_bounds = array<i64: 128, 384>}, {pipeline_mode = #tpu.pipeline_mode<synchronous>, transform_indices = @transform_5, window_bounds = array<i64: 1, 384>}, {pipeline_mode = #tpu.pipeline_mode<synchronous>, transform_indices = @transform_6, window_bounds = array<i64: 128, 128>}, {pipeline_mode = #tpu.pipeline_mode<synchronous>, transform_indices = @transform_7, window_bounds = array<i64: 1, 128>}, {pipeline_mode = #tpu.pipeline_mode<synchronous>, transform_indices = @transform_8, window_bounds = array<i64: 1, 128>}, {pipeline_mode = #tpu.pipeline_mode<synchronous>, transform_indices = @transform_9, window_bounds = array<i64: 1, 128>}, {transform_indices = @transform_10, window_bounds = array<i64: 1, 32, 128>}]} {
    %c0 = arith.constant 0 : index
    %c0_0 = arith.constant 0 : index
    %c0_1 = arith.constant 0 : index
    %0 = vector.load %arg1[%c0, %c0_0, %c0_1] : memref<1x32x128xbf16, #tpu.memory_space<vmem>>, vector<1x32x128xbf16>
    %1 = vector.shape_cast %0 : vector<1x32x128xbf16> to vector<32x128xbf16>
    %2 = arith.extf %1 : vector<32x128xbf16> to vector<32x128xf32>
    %c0_2 = arith.constant 0 : index
    %c0_3 = arith.constant 0 : index
    %3 = vector.load %arg2[%c0_2, %c0_3] : memref<32x128xbf16, #tpu.memory_space<vmem>>, vector<32x128xbf16>
    %4 = arith.extf %3 : vector<32x128xbf16> to vector<32x128xf32>
    %5 = arith.addf %2, %4 : vector<32x128xf32>
    %6 = arith.truncf %5 : vector<32x128xf32> to vector<32x128xbf16>
    %c0_4 = arith.constant 0 : index
    %c0_5 = arith.constant 0 : index
    %7 = vector.load %arg3[%c0_4, %c0_5] : memref<128x128xbf16, #tpu.memory_space<vmem>>, vector<128x128xbf16>
    %cst = arith.constant dense<0.000000e+00> : vector<32x128xf32>
    %8 = tpu.matmul %6, %7, %cst {dimension_numbers = #tpu.dot_dimension_numbers<[1], [0], [0], [1], [0, 0, 1, 1], [], []>} : vector<32x128xbf16>, vector<128x128xbf16>, vector<32x128xf32> -> vector<32x128xf32>
    %c0_6 = arith.constant 0 : index
    %c0_7 = arith.constant 0 : index
    %9 = vector.load %arg4[%c0_6, %c0_7] : memref<1x128xf32, #tpu.memory_space<vmem>>, vector<1x128xf32>
    %10 = vector.broadcast %9 : vector<1x128xf32> to vector<32x128xf32>
    %11 = arith.addf %8, %10 : vector<32x128xf32>
    %cst_8 = arith.constant 0.000000e+00 : f32
    %12 = vector.broadcast %cst_8 : f32 to vector<32x128xf32>
    %13 = arith.maximumf %11, %12 : vector<32x128xf32>
    %14 = arith.truncf %13 : vector<32x128xf32> to vector<32x128xbf16>
    %c0_9 = arith.constant 0 : index
    %c0_10 = arith.constant 0 : index
    %15 = vector.load %arg5[%c0_9, %c0_10] : memref<128x384xbf16, #tpu.memory_space<vmem>>, vector<128x384xbf16>
    %cst_11 = arith.constant dense<0.000000e+00> : vector<32x384xf32>
    %16 = tpu.matmul %14, %15, %cst_11 {dimension_numbers = #tpu.dot_dimension_numbers<[1], [0], [0], [1], [0, 0, 1, 1], [], []>} : vector<32x128xbf16>, vector<128x384xbf16>, vector<32x384xf32> -> vector<32x384xf32>
    %c0_12 = arith.constant 0 : index
    %c0_13 = arith.constant 0 : index
    %17 = vector.load %arg6[%c0_12, %c0_13] : memref<1x384xf32, #tpu.memory_space<vmem>>, vector<1x384xf32>
    %18 = vector.broadcast %17 : vector<1x384xf32> to vector<32x384xf32>
    %19 = arith.addf %16, %18 : vector<32x384xf32>
    %20 = vector.extract_strided_slice %19 {offsets = [0, 0], sizes = [32, 128], strides = [1, 1]} : vector<32x384xf32> to vector<32x128xf32>
    %21 = arith.truncf %20 : vector<32x128xf32> to vector<32x128xbf16>
    %22 = vector.extract_strided_slice %19 {offsets = [0, 128], sizes = [32, 128], strides = [1, 1]} : vector<32x384xf32> to vector<32x128xf32>
    %23 = arith.truncf %22 : vector<32x128xf32> to vector<32x128xbf16>
    %24 = vector.extract_strided_slice %19 {offsets = [0, 256], sizes = [32, 128], strides = [1, 1]} : vector<32x384xf32> to vector<32x128xf32>
    %25 = arith.truncf %24 : vector<32x128xf32> to vector<32x128xbf16>
    %26 = vector.extract_strided_slice %21 {offsets = [0, 0], sizes = [32, 32], strides = [1, 1]} : vector<32x128xbf16> to vector<32x32xbf16>
    %27 = vector.extract_strided_slice %23 {offsets = [0, 0], sizes = [32, 32], strides = [1, 1]} : vector<32x128xbf16> to vector<32x32xbf16>
    %28 = vector.extract_strided_slice %25 {offsets = [0, 0], sizes = [32, 32], strides = [1, 1]} : vector<32x128xbf16> to vector<32x32xbf16>
    %cst_14 = arith.constant dense<0.000000e+00> : vector<32x32xf32>
    %29 = tpu.matmul %26, %27, %cst_14 {dimension_numbers = #tpu.dot_dimension_numbers<[1], [1], [0], [0], [0, 0, 1, 0], [], []>} : vector<32x32xbf16>, vector<32x32xbf16>, vector<32x32xf32> -> vector<32x32xf32>
    %cst_15 = arith.constant 0.176776692 : f32
    %30 = vector.broadcast %cst_15 : f32 to vector<32x32xf32>
    %31 = arith.mulf %29, %30 : vector<32x32xf32>
    %cst_16 = arith.constant dense<0xFF800000> : vector<32xf32>
    %32 = vector.multi_reduction <maximumf>, %31, %cst_16 [1] : vector<32x32xf32> to vector<32xf32>
    %33 = vector.shape_cast %32 : vector<32xf32> to vector<32x1xf32>
    %34 = vector.broadcast %33 : vector<32x1xf32> to vector<32x32xf32>
    %35 = arith.subf %31, %34 : vector<32x32xf32>
    %36 = math.exp %35 : vector<32x32xf32>
    %cst_17 = arith.constant dense<0.000000e+00> : vector<32xf32>
    %37 = vector.multi_reduction <add>, %36, %cst_17 [1] : vector<32x32xf32> to vector<32xf32>
    %38 = vector.shape_cast %37 : vector<32xf32> to vector<32x1xf32>
    %39 = tpu.reciprocal %38 {approx = true} : vector<32x1xf32> -> vector<32x1xf32>
    %40 = vector.broadcast %39 : vector<32x1xf32> to vector<32x32xf32>
    %41 = arith.mulf %36, %40 : vector<32x32xf32>
    %42 = arith.truncf %41 : vector<32x32xf32> to vector<32x32xbf16>
    %cst_18 = arith.constant dense<0.000000e+00> : vector<32x32xf32>
    %43 = tpu.matmul %42, %28, %cst_18 {dimension_numbers = #tpu.dot_dimension_numbers<[1], [0], [0], [1], [0, 0, 1, 1], [], []>} : vector<32x32xbf16>, vector<32x32xbf16>, vector<32x32xf32> -> vector<32x32xf32>
    %44 = vector.extract_strided_slice %21 {offsets = [0, 32], sizes = [32, 32], strides = [1, 1]} : vector<32x128xbf16> to vector<32x32xbf16>
    %45 = vector.extract_strided_slice %23 {offsets = [0, 32], sizes = [32, 32], strides = [1, 1]} : vector<32x128xbf16> to vector<32x32xbf16>
    %46 = vector.extract_strided_slice %25 {offsets = [0, 32], sizes = [32, 32], strides = [1, 1]} : vector<32x128xbf16> to vector<32x32xbf16>
    %cst_19 = arith.constant dense<0.000000e+00> : vector<32x32xf32>
    %47 = tpu.matmul %44, %45, %cst_19 {dimension_numbers = #tpu.dot_dimension_numbers<[1], [1], [0], [0], [0, 0, 1, 0], [], []>} : vector<32x32xbf16>, vector<32x32xbf16>, vector<32x32xf32> -> vector<32x32xf32>
    %cst_20 = arith.constant 0.176776692 : f32
    %48 = vector.broadcast %cst_20 : f32 to vector<32x32xf32>
    %49 = arith.mulf %47, %48 : vector<32x32xf32>
    %cst_21 = arith.constant dense<0xFF800000> : vector<32xf32>
    %50 = vector.multi_reduction <maximumf>, %49, %cst_21 [1] : vector<32x32xf32> to vector<32xf32>
    %51 = vector.shape_cast %50 : vector<32xf32> to vector<32x1xf32>
    %52 = vector.broadcast %51 : vector<32x1xf32> to vector<32x32xf32>
    %53 = arith.subf %49, %52 : vector<32x32xf32>
    %54 = math.exp %53 : vector<32x32xf32>
    %cst_22 = arith.constant dense<0.000000e+00> : vector<32xf32>
    %55 = vector.multi_reduction <add>, %54, %cst_22 [1] : vector<32x32xf32> to vector<32xf32>
    %56 = vector.shape_cast %55 : vector<32xf32> to vector<32x1xf32>
    %57 = tpu.reciprocal %56 {approx = true} : vector<32x1xf32> -> vector<32x1xf32>
    %58 = vector.broadcast %57 : vector<32x1xf32> to vector<32x32xf32>
    %59 = arith.mulf %54, %58 : vector<32x32xf32>
    %60 = arith.truncf %59 : vector<32x32xf32> to vector<32x32xbf16>
    %cst_23 = arith.constant dense<0.000000e+00> : vector<32x32xf32>
    %61 = tpu.matmul %60, %46, %cst_23 {dimension_numbers = #tpu.dot_dimension_numbers<[1], [0], [0], [1], [0, 0, 1, 1], [], []>} : vector<32x32xbf16>, vector<32x32xbf16>, vector<32x32xf32> -> vector<32x32xf32>
    %62 = vector.extract_strided_slice %21 {offsets = [0, 64], sizes = [32, 32], strides = [1, 1]} : vector<32x128xbf16> to vector<32x32xbf16>
    %63 = vector.extract_strided_slice %23 {offsets = [0, 64], sizes = [32, 32], strides = [1, 1]} : vector<32x128xbf16> to vector<32x32xbf16>
    %64 = vector.extract_strided_slice %25 {offsets = [0, 64], sizes = [32, 32], strides = [1, 1]} : vector<32x128xbf16> to vector<32x32xbf16>
    %cst_24 = arith.constant dense<0.000000e+00> : vector<32x32xf32>
    %65 = tpu.matmul %62, %63, %cst_24 {dimension_numbers = #tpu.dot_dimension_numbers<[1], [1], [0], [0], [0, 0, 1, 0], [], []>} : vector<32x32xbf16>, vector<32x32xbf16>, vector<32x32xf32> -> vector<32x32xf32>
    %cst_25 = arith.constant 0.176776692 : f32
    %66 = vector.broadcast %cst_25 : f32 to vector<32x32xf32>
    %67 = arith.mulf %65, %66 : vector<32x32xf32>
    %cst_26 = arith.constant dense<0xFF800000> : vector<32xf32>
    %68 = vector.multi_reduction <maximumf>, %67, %cst_26 [1] : vector<32x32xf32> to vector<32xf32>
    %69 = vector.shape_cast %68 : vector<32xf32> to vector<32x1xf32>
    %70 = vector.broadcast %69 : vector<32x1xf32> to vector<32x32xf32>
    %71 = arith.subf %67, %70 : vector<32x32xf32>
    %72 = math.exp %71 : vector<32x32xf32>
    %cst_27 = arith.constant dense<0.000000e+00> : vector<32xf32>
    %73 = vector.multi_reduction <add>, %72, %cst_27 [1] : vector<32x32xf32> to vector<32xf32>
    %74 = vector.shape_cast %73 : vector<32xf32> to vector<32x1xf32>
    %75 = tpu.reciprocal %74 {approx = true} : vector<32x1xf32> -> vector<32x1xf32>
    %76 = vector.broadcast %75 : vector<32x1xf32> to vector<32x32xf32>
    %77 = arith.mulf %72, %76 : vector<32x32xf32>
    %78 = arith.truncf %77 : vector<32x32xf32> to vector<32x32xbf16>
    %cst_28 = arith.constant dense<0.000000e+00> : vector<32x32xf32>
    %79 = tpu.matmul %78, %64, %cst_28 {dimension_numbers = #tpu.dot_dimension_numbers<[1], [0], [0], [1], [0, 0, 1, 1], [], []>} : vector<32x32xbf16>, vector<32x32xbf16>, vector<32x32xf32> -> vector<32x32xf32>
    %80 = vector.extract_strided_slice %21 {offsets = [0, 96], sizes = [32, 32], strides = [1, 1]} : vector<32x128xbf16> to vector<32x32xbf16>
    %81 = vector.extract_strided_slice %23 {offsets = [0, 96], sizes = [32, 32], strides = [1, 1]} : vector<32x128xbf16> to vector<32x32xbf16>
    %82 = vector.extract_strided_slice %25 {offsets = [0, 96], sizes = [32, 32], strides = [1, 1]} : vector<32x128xbf16> to vector<32x32xbf16>
    %cst_29 = arith.constant dense<0.000000e+00> : vector<32x32xf32>
    %83 = tpu.matmul %80, %81, %cst_29 {dimension_numbers = #tpu.dot_dimension_numbers<[1], [1], [0], [0], [0, 0, 1, 0], [], []>} : vector<32x32xbf16>, vector<32x32xbf16>, vector<32x32xf32> -> vector<32x32xf32>
    %cst_30 = arith.constant 0.176776692 : f32
    %84 = vector.broadcast %cst_30 : f32 to vector<32x32xf32>
    %85 = arith.mulf %83, %84 : vector<32x32xf32>
    %cst_31 = arith.constant dense<0xFF800000> : vector<32xf32>
    %86 = vector.multi_reduction <maximumf>, %85, %cst_31 [1] : vector<32x32xf32> to vector<32xf32>
    %87 = vector.shape_cast %86 : vector<32xf32> to vector<32x1xf32>
    %88 = vector.broadcast %87 : vector<32x1xf32> to vector<32x32xf32>
    %89 = arith.subf %85, %88 : vector<32x32xf32>
    %90 = math.exp %89 : vector<32x32xf32>
    %cst_32 = arith.constant dense<0.000000e+00> : vector<32xf32>
    %91 = vector.multi_reduction <add>, %90, %cst_32 [1] : vector<32x32xf32> to vector<32xf32>
    %92 = vector.shape_cast %91 : vector<32xf32> to vector<32x1xf32>
    %93 = tpu.reciprocal %92 {approx = true} : vector<32x1xf32> -> vector<32x1xf32>
    %94 = vector.broadcast %93 : vector<32x1xf32> to vector<32x32xf32>
    %95 = arith.mulf %90, %94 : vector<32x32xf32>
    %96 = arith.truncf %95 : vector<32x32xf32> to vector<32x32xbf16>
    %cst_33 = arith.constant dense<0.000000e+00> : vector<32x32xf32>
    %97 = tpu.matmul %96, %82, %cst_33 {dimension_numbers = #tpu.dot_dimension_numbers<[1], [0], [0], [1], [0, 0, 1, 1], [], []>} : vector<32x32xbf16>, vector<32x32xbf16>, vector<32x32xf32> -> vector<32x32xf32>
    %98 = tpu.concatenate %43, %61, %79, %97 in 1 : vector<32x32xf32>, vector<32x32xf32>, vector<32x32xf32>, vector<32x32xf32> -> vector<32x128xf32>
    %99 = arith.truncf %98 : vector<32x128xf32> to vector<32x128xbf16>
    %c0_34 = arith.constant 0 : index
    %c0_35 = arith.constant 0 : index
    %100 = vector.load %arg7[%c0_34, %c0_35] : memref<128x128xbf16, #tpu.memory_space<vmem>>, vector<128x128xbf16>
    %cst_36 = arith.constant dense<0.000000e+00> : vector<32x128xf32>
    %101 = tpu.matmul %99, %100, %cst_36 {dimension_numbers = #tpu.dot_dimension_numbers<[1], [0], [0], [1], [0, 0, 1, 1], [], []>} : vector<32x128xbf16>, vector<128x128xbf16>, vector<32x128xf32> -> vector<32x128xf32>
    %c0_37 = arith.constant 0 : index
    %c0_38 = arith.constant 0 : index
    %102 = vector.load %arg8[%c0_37, %c0_38] : memref<1x128xf32, #tpu.memory_space<vmem>>, vector<1x128xf32>
    %103 = vector.broadcast %102 : vector<1x128xf32> to vector<32x128xf32>
    %104 = arith.addf %101, %103 : vector<32x128xf32>
    %cst_39 = arith.constant 0.000000e+00 : f32
    %105 = vector.broadcast %cst_39 : f32 to vector<32x128xf32>
    %106 = arith.maximumf %104, %105 : vector<32x128xf32>
    %107 = arith.addf %106, %2 : vector<32x128xf32>
    %cst_40 = arith.constant dense<0.000000e+00> : vector<32xf32>
    %108 = vector.multi_reduction <add>, %107, %cst_40 [1] : vector<32x128xf32> to vector<32xf32>
    %109 = vector.shape_cast %108 : vector<32xf32> to vector<32x1xf32>
    %cst_41 = arith.constant 1.280000e+02 : f32
    %110 = vector.broadcast %cst_41 : f32 to vector<32x1xf32>
    %111 = arith.divf %109, %110 : vector<32x1xf32>
    %112 = vector.broadcast %111 : vector<32x1xf32> to vector<32x128xf32>
    %113 = arith.subf %107, %112 : vector<32x128xf32>
    %114 = arith.mulf %113, %113 : vector<32x128xf32>
    %cst_42 = arith.constant dense<0.000000e+00> : vector<32xf32>
    %115 = vector.multi_reduction <add>, %114, %cst_42 [1] : vector<32x128xf32> to vector<32xf32>
    %116 = vector.shape_cast %115 : vector<32xf32> to vector<32x1xf32>
    %cst_43 = arith.constant 1.280000e+02 : f32
    %117 = vector.broadcast %cst_43 : f32 to vector<32x1xf32>
    %118 = arith.divf %116, %117 : vector<32x1xf32>
    %cst_44 = arith.constant 9.99999974E-6 : f32
    %119 = vector.broadcast %cst_44 : f32 to vector<32x1xf32>
    %120 = arith.addf %118, %119 : vector<32x1xf32>
    %121 = math.rsqrt %120 : vector<32x1xf32>
    %122 = vector.broadcast %121 : vector<32x1xf32> to vector<32x128xf32>
    %123 = arith.mulf %113, %122 : vector<32x128xf32>
    %c0_45 = arith.constant 0 : index
    %c0_46 = arith.constant 0 : index
    %124 = vector.load %arg9[%c0_45, %c0_46] : memref<1x128xf32, #tpu.memory_space<vmem>>, vector<1x128xf32>
    %125 = vector.broadcast %124 : vector<1x128xf32> to vector<32x128xf32>
    %126 = arith.mulf %123, %125 : vector<32x128xf32>
    %c0_47 = arith.constant 0 : index
    %c0_48 = arith.constant 0 : index
    %127 = vector.load %arg10[%c0_47, %c0_48] : memref<1x128xf32, #tpu.memory_space<vmem>>, vector<1x128xf32>
    %128 = vector.broadcast %127 : vector<1x128xf32> to vector<32x128xf32>
    %129 = arith.addf %126, %128 : vector<32x128xf32>
    %130 = arith.truncf %129 : vector<32x128xf32> to vector<32x128xbf16>
    %c0_49 = arith.constant 0 : index
    %c0_50 = arith.constant 0 : index
    %c0_51 = arith.constant 0 : index
    %131 = vector.load %arg11[%c0_49, %c0_50, %c0_51] : memref<1x32x128xbf16, #tpu.memory_space<vmem>>, vector<1x32x128xbf16>
    %132 = vector.shape_cast %131 : vector<1x32x128xbf16> to vector<32x128xbf16>
    %133 = vector.shape_cast %130 : vector<32x128xbf16> to vector<1x32x128xbf16>
    tpu.vector_store %arg11[%c0_49, %c0_50, %c0_51], %133 {strides = array<i32>} : memref<1x32x128xbf16, #tpu.memory_space<vmem>>, vector<1x32x128xbf16>,
    return
  }
  func.func @transform_0(%arg0: i32) -> (i32, i32, i32) {
    %c0_i32 = arith.constant 0 : i32
    %c0_i32_0 = arith.constant 0 : i32
    %c0_i32_1 = arith.constant 0 : i32
    return %arg0, %c0_i32, %c0_i32_0 : i32, i32, i32
  }
  func.func @transform_1(%arg0: i32) -> (i32, i32) {
    %c0_i32 = arith.constant 0 : i32
    %c0_i32_0 = arith.constant 0 : i32
    %c0_i32_1 = arith.constant 0 : i32
    return %c0_i32, %c0_i32_0 : i32, i32
  }
  func.func @transform_2(%arg0: i32) -> (i32, i32) {
    %c0_i32 = arith.constant 0 : i32
    %c0_i32_0 = arith.constant 0 : i32
    %c0_i32_1 = arith.constant 0 : i32
    return %c0_i32, %c0_i32_0 : i32, i32
  }
  func.func @transform_3(%arg0: i32) -> (i32, i32) {
    %c0_i32 = arith.constant 0 : i32
    %c0_i32_0 = arith.constant 0 : i32
    %c0_i32_1 = arith.constant 0 : i32
    return %c0_i32, %c0_i32_0 : i32, i32
  }
  func.func @transform_4(%arg0: i32) -> (i32, i32) {
    %c0_i32 = arith.constant 0 : i32
    %c0_i32_0 = arith.constant 0 : i32
    %c0_i32_1 = arith.constant 0 : i32
    return %c0_i32, %c0_i32_0 : i32, i32
  }
  func.func @transform_5(%arg0: i32) -> (i32, i32) {
    %c0_i32 = arith.constant 0 : i32
    %c0_i32_0 = arith.constant 0 : i32
    %c0_i32_1 = arith.constant 0 : i32
    return %c0_i32, %c0_i32_0 : i32, i32
  }
  func.func @transform_6(%arg0: i32) -> (i32, i32) {
    %c0_i32 = arith.constant 0 : i32
    %c0_i32_0 = arith.constant 0 : i32
    %c0_i32_1 = arith.constant 0 : i32
    return %c0_i32, %c0_i32_0 : i32, i32
  }
  func.func @transform_7(%arg0: i32) -> (i32, i32) {
    %c0_i32 = arith.constant 0 : i32
    %c0_i32_0 = arith.constant 0 : i32
    %c0_i32_1 = arith.constant 0 : i32
    return %c0_i32, %c0_i32_0 : i32, i32
  }
  func.func @transform_8(%arg0: i32) -> (i32, i32) {
    %c0_i32 = arith.constant 0 : i32
    %c0_i32_0 = arith.constant 0 : i32
    %c0_i32_1 = arith.constant 0 : i32
    return %c0_i32, %c0_i32_0 : i32, i32
  }
  func.func @transform_9(%arg0: i32) -> (i32, i32) {
    %c0_i32 = arith.constant 0 : i32
    %c0_i32_0 = arith.constant 0 : i32
    %c0_i32_1 = arith.constant 0 : i32
    return %c0_i32, %c0_i32_0 : i32, i32
  }
  func.func @transform_10(%arg0: i32) -> (i32, i32, i32) {
    %c0_i32 = arith.constant 0 : i32
    %c0_i32_0 = arith.constant 0 : i32
    %c0_i32_1 = arith.constant 0 : i32
    return %arg0, %c0_i32, %c0_i32_0 : i32, i32, i32
  }
}

</mosaic_0001>

<bundles_post_ra>
// kernel: encoder_forward.2
= control target key start
LH: loop header
LB: loop body
LE: loop exit
PB: predicated region body
PF: predicated region fallthrough
CT: control target
= control target key end

     0   :  { %15 = vsyncpa [#allocation3], 0  ;;  %s2884_s0 = inlined_call_operand.vmem [shape: bf16[2,32,128], index: 0, kind: input, shape index: {}]   ;;  %s2885_s1 = inlined_call_operand.vmem [shape: bf16[32,128], index: 1, kind: input, shape index: {}]   ;;  %s2886_s2 = inlined_call_operand.vmem [shape: bf16[128,128], index: 2, kind: input, shape index: {}]   ;;  %s2887_s3 = inlined_call_operand.vmem [shape: f32[1,128], index: 3, kind: input, shape index: {}]   ;;  %s2888_s4 = inlined_call_operand.hbm [shape: bf16[128,384], index: 4, kind: input, shape index: {}]   ;;  %s2889_s5 = inlined_call_operand.vmem [shape: f32[1,384], index: 5, kind: input, shape index: {}]   ;;  %s2890_s6 = inlined_call_operand.hbm [shape: bf16[128,128], index: 6, kind: input, shape index: {}]   ;;  %s2891_s7 = inlined_call_operand.vmem [shape: f32[1,128], index: 7, kind: input, shape index: {}]   ;;  %s2892_s8 = inlined_call_operand.vmem [shape: f32[1,128], index: 8, kind: input, shape index: {}]   ;;  %s2893_s9 = inlined_call_operand.vmem [shape: f32[1,128], index: 9, kind: input, shape index: {}]   ;;  %s2894_s10 = inlined_call_operand.vmem [shape: bf16[2,32,128], index: 10, kind: output, shape index: {}]  }
   0x1   :  { %16 = vsyncpa [#allocation5], 0  ;;  %s2525_s13 = smov 0  }
   0x2 LB: > { %s2460_s14 = smov [#allocation2]   ;;  %s2531_s16 = sadd.s32 4294967295, %s2458_s13   ;;  %s2458_s13 = sphi %s2525_s13, %s22_s13  }
   0x3   : > { %s289_s15 = sshll.u32 %s2460_s14, 4  ;;  %p1895_p0 = scmp.ge.s32.totalorder %s2458_s13, 1  ;;  %s290_s15 = int_to_ptr.vmem [resolvable:$true] %s289_s15 }
   0x4   : > { %p268_p1 = scmp.lt.s32.totalorder %s2458_s13, 3  ;;  %p2895_p3 = scmp.eq.s32.totalorder %s2531_s16, 0 }
   0x5   : > { %s2461_s18 = smov [#allocation4]   ;;  %s2388_s23 = scalar_lea.hbm %s2888_s4, 3072 }
   0x6   : > { %p2535_p2 = pnand %p1895_p0, %p268_p1  ;;  %s305_s19 = sshll.u32 %s2461_s18, 4  ;;  %s2548_s19 = int_to_ptr.vmem [resolvable:$true] %s305_s19 }
   0x7   : > { %p2389_p6 = scmp.ne.s32.totalorder %s2888_s4, %s2388_s23  ;;  %p2395_p10 = scmp.lt.u32.totalorder %s2388_s23, %s2888_s4 }
   0x8   : > { %s2897_s17 = scalar_select %p2535_p2, 1, 0 }
   0x9   : > { %p2209_p4 = pneg %p2535_p2 }
   0xb   : > { %p2544_p5 = pnand %p2895_p3, %p2209_p4 }
   0xd   : > { %p2390_p7 = pneg %p2544_p5 }
   0xf   : > { %p2391_p8 = pnand %p2390_p7, %p2389_p6 }
  0x11   : > { %p2392_p9 = pneg %p2391_p8 }
  0x13   : > { %p2397_p11 = pnand %p2395_p10, %p2392_p9 }
  0x15   : > { %2400 = shalt.err (!%p2397_p11)
}
  0x16   : > { %s2401_s28 = scalar_lea.vmem %s290_s15, 3072  ;;  %p2409_p1 = scmp.lt.s32.totalorder %s290_s15, %s290_s15 }
  0x17   : > { %p2402_p12 = scmp.ne.s32.totalorder %s290_s15, %s2401_s28  ;;  %p2410_p4 = scmp.lt.s32.totalorder %s2401_s28, %s2401_s28 }
  0x19   : > { %p2404_p13 = pnand %p2402_p12, %p2390_p7  ;;  %p2411_p3 = por %p2410_p4, %p2409_p1 }
  0x1b   : > { %p2405_p0 = pneg %p2404_p13 }
  0x1d   : > { %p2412_p2 = pnand %p2411_p3, %p2405_p0 }
  0x1f   : > { %2415 = shalt.err (!%p2412_p2)
}
  0x20   : > { %s2462_s29 = smov 192   ;;  %s2463_s30 = smov 12  }
  0x21   : > { %2212 = dma.hbm_to_vmem [thread:$0]  (!%p2544_p5), %s2888_s4, 3072, %s290_s15, [#allocation3], %s2462_s29, %s2462_s29, %s2463_s30  }
  0x22   : > { %s2416_s21 = scalar_lea.hbm %s2890_s6, 1024 }
  0x23   : > { %p2417_p6 = scmp.ne.s32.totalorder %s2890_s6, %s2416_s21  ;;  %p2423_p8 = scmp.lt.u32.totalorder %s2416_s21, %s2890_s6 }
  0x25   : > { %p2419_p2 = pnand %p2417_p6, %p2390_p7 }
  0x27   : > { %p2420_p3 = pneg %p2419_p2 }
  0x29   : > { %p2425_p9 = pnand %p2423_p8, %p2420_p3 }
  0x2b   : > { %2428 = shalt.err (!%p2425_p9)
}
  0x2c   : > { %s2429_s15 = scalar_lea.vmem %s2548_s19, 1024  ;;  %p2437_p13 = scmp.lt.s32.totalorder %s2548_s19, %s2548_s19 }
  0x2d   : > { %p2430_p10 = scmp.ne.s32.totalorder %s2548_s19, %s2429_s15  ;;  %p2438_p0 = scmp.lt.s32.totalorder %s2429_s15, %s2429_s15 }
  0x2f   : > { %p2432_p11 = pnand %p2430_p10, %p2390_p7  ;;  %p2439_p1 = por %p2438_p0, %p2437_p13 }
  0x31   : > { %p2433_p12 = pneg %p2432_p11 }
  0x33   : > { %p2440_p4 = pnand %p2439_p1, %p2433_p12 }
  0x35   : > { %2443 = shalt.err (!%p2440_p4)
}
  0x36   : > { %s2464_s26 = smov 64   ;;  %s2465_s27 = smov 4  }
  0x37   : > { %2215 = dma.hbm_to_vmem [thread:$0]  (!%p2544_p5), %s2890_s6, 1024, %s2548_s19, [#allocation5], %s2464_s26, %s2464_s26, %s2465_s27  }
  0x38   : > { %p2899_p6 = scmp.ne.s32.totalorder %s2897_s17, 0 }
  0x39   : > { %p2900_p7 = scmp.eq.s32.totalorder (!%p2899_p6), %s2531_s16, 0 }
  0x3a   : > { %338 = sbr.rel (%p2899_p6) target bundleno = 3113 (0xc29), region = 60 }
  0x41   : > { %2449 = dma.done.wait (%p2900_p7), [#allocation3], 3072   ;;  %p2901_p2 = pmov %p2900_p7 }
  0x43   : > { %2451 = vsyncadd (%p2901_p2), [#allocation3], 4294964224  ;;  %p2902_p3 = pmov %p2901_p2 }
  0x44   : > { %p2903_p8 = pmov %p2901_p2 }
  0x45   : > { %2453 = dma.done.wait (%p2902_p3), [#allocation5], 1024  }
  0x46   : > { %2455 = vsyncadd (%p2903_p8), [#allocation5], 4294966272  ;;  %p380_p9 = scmp.lt.s32.totalorder %s2531_s16, 1  ;;  %v2268_v0 = vld [vmem:[%s2886_s2] sm:$0xff]   ;;  %v2269_v1 = vld [vmem:[%s2886_s2 + $0x8] sm:$0xff]   ;;  %v2466_v50 = vmov 0  }
  0x47   : > { %2069 = vmatprep.subr.bf16.mxu0 %v2268_v0  ;;  %v2270_v2 = vld [vmem:[%s2886_s2 + $0x10] sm:$0xff]   ;;  %v2271_v3 = vld [vmem:[%s2886_s2 + $0x18] sm:$0xff]   ;;  %v1987_v5 = vld [vmem:[%s2885_s1] sm:$0xff]   ;;  %748 = vmatprep.mubr.bf16.mxu1 %v2466_v50  ;;  %vm824_vm0 = vcmask 261120   ;;  %s2467_s24 = smov 96   ;;  %s2468_s25 = smov 64  }
  0x48   : > { %s2905_s16 = smov (!%p380_p9, %s2531_s16), 1  ;;  %2070 = vmatpush3.bf16.msra.mxu0 %v2268_v0  ;;  %v1988_v8 = vunpack.c.l.bf16 %v1987_v5  ;;  %v1989_v9 = vunpack.c.h.bf16 %v1987_v5  ;;  %v2276_v10 = vld [vmem:[#allocation2 + $0x4] ss:$12 sps:$4 sm:$0xff]   ;;  %v2278_v11 = vld [vmem:[#allocation2] ss:$12 sps:$4 sm:$0xff]   ;;  %v2275_v26 = vld [vmem:[%s2886_s2 + $0x38] sm:$0xff]  }
  0x49   : > { %s1972_s11 = sshll.u32 %s2905_s16, 4  ;;  %2071 = vmatprep.subr.bf16.mxu0 %v2269_v1  ;;  %v2272_v14 = vld [vmem:[%s2886_s2 + $0x20] sm:$0xff]   ;;  %716 = vmatprep.subr.bf16.mxu1 %v2276_v10  ;;  %v2280_v15 = vld [vmem:[#allocation2 + $0x1c] ss:$12 sps:$4 sm:$0xff]   ;;  %v2288_v21 = vld [vmem:[#allocation2 + $0x4c] ss:$12 sps:$4 sm:$0xff]  }
  0x4a   : > { %s2626_s22 = scalar_lea.vmem %s2884_s0, %s1972_s11  ;;  %717 = vmatpush1.bf16.msra.mxu1 %v2278_v11  ;;  %v2282_v17 = vld [vmem:[#allocation2 + $0x18] ss:$12 sps:$4 sm:$0xff]   ;;  %v2284_v18 = vld [vmem:[#allocation2 + $0x34] ss:$12 sps:$4 sm:$0xff]   ;;  %v2273_v19 = vld [vmem:[%s2886_s2 + $0x28] sm:$0xff]   ;;  %s2469_s15 = smov 32  }
  0x4b   : > { %v2632_v4 = vld [vmem:[%s2626_s22] sm:$0xff]   ;;  %718 = vmatprep.subr.bf16.mxu1 %v2280_v15  ;;  %v2286_v20 = vld [vmem:[#allocation2 + $0x30] ss:$12 sps:$4 sm:$0xff]   ;;  %v2650_v22 = vld [vmem:[%s2626_s22 + $0x8] sm:$0xff]   ;;  %vm1589_vm1 = vcmask 523264   ;;  %vm1594_vm2 = vcmask 785408   ;;  %s389_s12 = scalar_lea.vmem %s2894_s10, %s1972_s11 }
  0x4c   : > { %2072 = vmatpush3.bf16.msra.mxu0 %v2269_v1  ;;  %v1980_v6 = vunpack.c.l.bf16 %v2632_v4  ;;  %v1981_v7 = vunpack.c.h.bf16 %v2632_v4  ;;  %v2005_v23 = vld [vmem:[%s2885_s1 + $0x8] sm:$0xff]   ;;  %v2274_v24 = vld [vmem:[%s2886_s2 + $0x30] sm:$0xff]   ;;  %v1984_v27 = vunpack.c.l.bf16 %v2650_v22  ;;  %v1985_v28 = vunpack.c.h.bf16 %v2650_v22  ;;  %v2298_v37 = vld [vmem:[#allocation2 + $0x78] ss:$12 sps:$4 sm:$0xff]  }
  0x4d   : > { %2073 = vmatprep.subr.bf16.mxu0 %v2270_v2  ;;  %v2290_v25 = vld [vmem:[#allocation2 + $0x48] ss:$12 sps:$4 sm:$0xff]   ;;  %v1992_v29 = vunpack.c.l.bf16 %v2005_v23  ;;  %v1993_v30 = vunpack.c.h.bf16 %v2005_v23  ;;  %v2292_v31 = vld [vmem:[#allocation2 + $0x64] ss:$12 sps:$4 sm:$0xff]   ;;  %v2294_v32 = vld [vmem:[#allocation2 + $0x60] ss:$12 sps:$4 sm:$0xff]  }
  0x4e   : > { %v407_v12 = vadd.f32 %v1988_v8, %v1980_v6  ;;  %v408_v13 = vadd.f32 %v1989_v9, %v1981_v7  ;;  %719 = vmatpush1.bf16.msra.mxu1 %v2282_v17  ;;  %v2296_v33 = vld [vmem:[#allocation2 + $0x7c] ss:$12 sps:$4 sm:$0xff]   ;;  %v2283_v39 = vld [vmem:[#allocation2 + $0x20] ss:$12 sps:$4 sm:$0xff]   ;;  %v2287_v40 = vld [vmem:[#allocation2 + $0x38] ss:$12 sps:$4 sm:$0xff]  }
  0x4f   : > { %720 = vmatprep.subr.bf16.mxu1 %v2284_v18  ;;  %v409_v34 = vadd.f32 %v1992_v29, %v1984_v27  ;;  %v410_v35 = vadd.f32 %v1993_v30, %v1985_v28  ;;  %v2279_v36 = vld [vmem:[#allocation2 + $0x8] ss:$12 sps:$4 sm:$0xff]   ;;  %v2291_v41 = vld [vmem:[#allocation2 + $0x50] ss:$12 sps:$4 sm:$0xff]   ;;  %v2299_v43 = vld [vmem:[#allocation2 + $0x80] ss:$12 sps:$4 sm:$0xff]  }
  0x50   : > { %2074 = vmatpush3.bf16.msra.mxu0 %v2270_v2  ;;  %v411_v16 = vpack.c.bf16 %v408_v13, %v407_v12  ;;  %v2295_v42 = vld [vmem:[#allocation2 + $0x68] ss:$12 sps:$4 sm:$0xff]   ;;  %v2302_v45 = vld [vmem:[#allocation2 + $0x90] ss:$12 sps:$4 sm:$0xff]   ;;  %v2303_v46 = vld [vmem:[#allocation2 + $0x98] ss:$12 sps:$4 sm:$0xff]   ;;  %v573_v2 = vlaneseq }
  0x51   : > { %2075 = vmatprep.subr.bf16.mxu0 %v2271_v3  ;;  %v412_v38 = vpack.c.bf16 %v410_v35, %v409_v34  ;;  %v2300_v44 = vld [vmem:[#allocation2 + $0x94] ss:$12 sps:$4 sm:$0xff]   ;;  %v2304_v47 = vld [vmem:[#allocation2 + $0xac] ss:$12 sps:$4 sm:$0xff]   ;;  %v2307_v49 = vld [vmem:[#allocation2 + $0xb0] ss:$12 sps:$4 sm:$0xff]  }
  0x52   : > { %2085 = vmatprep.mubr.bf16.mxu0 %v411_v16  ;;  %721 = vmatpush1.bf16.msra.mxu1 %v2286_v20  ;;  %v2306_v48 = vld [vmem:[#allocation2 + $0xa8] ss:$12 sps:$4 sm:$0xff]   ;;  %v1906_v51 = vld [vmem:[%s2887_s3] ss:$0 sm:$0xff] }
  0x53   : > { %722 = vmatprep.subr.bf16.mxu1 %v2288_v21  ;;  %v571_v8 = vld [vmem:[%s2889_s5] sm:$0x7] }
  0x54   : > { %2076 = vmatpush3.bf16.msra.mxu0 %v2271_v3  ;;  %v574_v3 = vshrl.u32 %v573_v2, 7 }
  0x55   : > { %2077 = vmatprep.subr.bf16.mxu0 %v2272_v14 }
  0x56   : > { %723 = vmatpush1.bf16.msra.mxu1 %v2290_v25  ;;  %v575_v5 = vsub.s32 0, %v574_v3  ;;  %v579_v9 = vsub.s32 1, %v574_v3  ;;  %v583_v10 = vsub.s32 2, %v574_v3 }
  0x57   : > { %724 = vmatprep.subr.bf16.mxu1 %v2292_v31 }
  0x58   : > { %2078 = vmatpush3.bf16.msra.mxu0 %v2272_v14  ;;  %v576_v11 = vrot.slane %v571_v8, %v575_v5  ;;  %v580_v13 = vrot.slane %v571_v8, %v579_v9  ;;  %v584_v14 = vrot.slane %v571_v8, %v583_v10 }
  0x59   : > { %2079 = vmatprep.subr.bf16.mxu0 %v2273_v19 }
  0x5a   : > { %725 = vmatpush1.bf16.msra.mxu1 %v2294_v32 }
  0x5b   : > { %726 = vmatprep.subr.bf16.mxu1 %v2296_v33 }
  0x5c   : > { %2080 = vmatpush3.bf16.msra.mxu0 %v2273_v19 }
  0x5d   : > { %2081 = vmatprep.subr.bf16.mxu0 %v2274_v24 }
  0x5e   : > { %727 = vmatpush1.bf16.msra.mxu1 %v2298_v37 }
  0x5f   : > { %728 = vmatprep.subr.bf16.mxu1 %v2300_v44 }
  0x60   : > { %2082 = vmatpush3.bf16.msra.mxu0 %v2274_v24 }
  0x61   : > { %2083 = vmatprep.subr.bf16.mxu0 %v2275_v26 }
  0x62   : > { %729 = vmatpush1.bf16.msra.mxu1 %v2302_v45 }
  0x63   : > { %730 = vmatprep.subr.bf16.mxu1 %v2304_v47 }
  0x64   : > { %2084 = vmatpush3.bf16.msra.mxu0 %v2275_v26 }
  0x65   : > { %2089 = vmatprep.subr.bf16.mxu0 %v2279_v36 }
  0x66   : > { %731 = vmatpush1.bf16.msra.mxu1 %v2306_v48 }
  0x67   : > { %2086 = vmatmul.mubr.bf16.vlgmr.msra.gmra.mrb[0].mxu0 %v412_v38 }
  0x68   : > { %2090 = vmatpush3.bf16.msra.mxu0 %v2279_v36 }
  0x69   : > { %2091 = vmatprep.subr.bf16.mxu0 %v2283_v39 }
  0x6c   : > { %2092 = vmatpush3.bf16.msra.mxu0 %v2283_v39 }
  0x6d   : > { %2093 = vmatprep.subr.bf16.mxu0 %v2287_v40 }
  0x70   : > { %2094 = vmatpush3.bf16.msra.mxu0 %v2287_v40 }
  0x71   : > { %2095 = vmatprep.subr.bf16.mxu0 %v2291_v41 }
  0x74   : > { %2096 = vmatpush3.bf16.msra.mxu0 %v2291_v41 }
  0x75   : > { %2097 = vmatprep.subr.bf16.mxu0 %v2295_v42 }
  0x78   : > { %2098 = vmatpush3.bf16.msra.mxu0 %v2295_v42 }
  0x79   : > { %2099 = vmatprep.subr.bf16.mxu0 %v2299_v43 }
  0x7c   : > { %2100 = vmatpush3.bf16.msra.mxu0 %v2299_v43 }
  0x7d   : > { %2101 = vmatprep.subr.bf16.mxu0 %v2303_v46 }
  0x80   : > { %2102 = vmatpush3.bf16.msra.mxu0 %v2303_v46 }
  0x81   : > { %2103 = vmatprep.subr.bf16.mxu0 %v2307_v49 }
  0x84   : > { %2104 = vmatpush3.bf16.msra.mxu0 %v2307_v49 }
 0x13a   : > { %v2087_v52 = vpop.f32.mrb[0].mxu0 }
 0x13b   : > { %v527_v53 = vadd.f32 %v2087_v52, %v1906_v51  ;;  %v518_v54 = vpop.f32.mrb[1].mxu0 }
 0x13c   : > { %v519_v55 = vadd.f32 %v1906_v51, %v518_v54  ;;  %v2088_v56 = vpop.f32.mrb[2].mxu0 }
 0x13d   : > { %v530_v57 = vadd.f32 %v2088_v56, %v1906_v51  ;;  %v521_v58 = vpop.f32.mrb[3].mxu0  ;;  %v535_v60 = vmax.f32 %v527_v53, 0.0 }
 0x13e   : > { %v522_v59 = vadd.f32 %v1906_v51, %v521_v58  ;;  %v533_v62 = vmax.f32 %v519_v55, 0.0 }
 0x13f   : > { %v536_v61 = vmax.f32 %v530_v57, 0.0 }
 0x140   : > { %v534_v63 = vmax.f32 %v522_v59, 0.0 }
 0x141   : > { %v538_v0 = vpack.c.bf16 %v536_v61, %v535_v60 }
 0x142   : > { %v537_v1 = vpack.c.bf16 %v534_v63, %v533_v62 }
 0x144   : > { %749 = vmatmul.mubr.bf16.vlgmr.msra.gmra.mrb[0].mxu1 %v537_v1  ;;  %2105 = vmatprep.mubr.bf16.mxu0 %v537_v1 }
 0x145   : > { %2106 = vmatmul.mubr.bf16.vlgmr.msra.gmra.mrb[4].mxu0 %v538_v0  ;;  %758 = vmatprep.mubr.bf16.mxu1 %v2466_v50 }
 0x14c   : > { %759 = vmatmul.mubr.bf16.gmra.mrb[4].mxu1 %v538_v0 }
 0x217   : > { %v750_v12 = vpop.f32.mrb[0].mxu1 }
 0x218   : > { %v752_v15 = vpop.f32.mrb[1].mxu1  ;;  %v2107_v16 = vpop.f32.mrb[4].mxu0  ;;  %v751_v19 = vadd.f32 %v750_v12, %v576_v11 }
 0x219   : > { %v754_v17 = vpop.f32.mrb[2].mxu1  ;;  %v803_v18 = vpop.f32.mrb[5].mxu0  ;;  %v753_v24 = vadd.f32 %v752_v15, %v580_v13  ;;  %v812_v25 = vadd.f32 %v2107_v16, %v584_v14 }
 0x21a   : > { %v755_v20 = vadd.f32 %v754_v17, %v576_v11  ;;  %v756_v21 = vpop.f32.mrb[3].mxu1  ;;  %v2108_v23 = vpop.f32.mrb[6].mxu0  ;;  %v804_v32 = vadd.f32 %v803_v18, %v584_v14 }
 0x21b   : > { %v757_v26 = vadd.f32 %v756_v21, %v580_v13  ;;  %v815_v29 = vadd.f32 %v2108_v23, %v584_v14  ;;  %v806_v30 = vpop.f32.mrb[7].mxu0 }
 0x21c   : > { %v2673_v31 = vpack.c.bf16 %v755_v20, %v751_v19  ;;  %v807_v33 = vadd.f32 %v806_v30, %v584_v14 }
 0x21d   : > { %v2675_v34 = vpack.c.bf16 %v757_v26, %v753_v24  ;;  %v2677_v35 = vpack.c.bf16 %v815_v29, %v812_v25 }
 0x21e   : > { %v2679_v36 = vpack.c.bf16 %v807_v33, %v804_v32  ;;  %2113 = vmatprep.mubr.msk.bf16.mxu1 %vm824_vm0, %v2673_v31 }
 0x21f   : > { %v760_v37 = vpop.f32.mrb[4].mxu1  ;;  %2193 = vmatprep.subr.msk.bf16.mxu1 %vm824_vm0, %v2675_v34  ;;  %v832_v38 = vsel %vm824_vm0, %v2675_v34, 0 }
 0x220   : > { %v762_v39 = vpop.f32.mrb[5].mxu1  ;;  %2110 = vmatpush3.bf16.xpose.msra.mxu1 %v832_v38  ;;  %v761_v41 = vadd.f32 %v760_v37, %v576_v11 }
 0x221   : > { %v764_v40 = vpop.f32.mrb[6].mxu1  ;;  %v763_v44 = vadd.f32 %v762_v39, %v580_v13 }
 0x222   : > { %v765_v42 = vadd.f32 %v764_v40, %v576_v11  ;;  %v766_v43 = vpop.f32.mrb[7].mxu1 }
 0x223   : > { %v767_v45 = vadd.f32 %v766_v43, %v580_v13 }
 0x224   : > { %v2687_v46 = vpack.c.bf16 %v765_v42, %v761_v41 }
 0x225   : > { %v2689_v47 = vpack.c.bf16 %v767_v45, %v763_v44 }
 0x227   : > { %2194 = vmatprep.subr.msk.bf16.mxu1 %vm824_vm0, %v2689_v47  ;;  %v835_v48 = vsel %vm824_vm0, %v2689_v47, 0 }
 0x228   : > { %2112 = vmatpush3.bf16.xpose.msra.mxu1 %v835_v48 }
 0x229   : > { %2117 = vmatprep.subr.bf16.mxu1 %v2679_v36 }
 0x22f   : > { %2114 = vmatmul.mubr.msk.bf16.vlgmr.msra.gmra.mrb[8].mxu1 %vm824_vm0, %v2687_v46 }
 0x230   : > { %2118 = vmatpush3.bf16.msra.mxu1 %v2679_v36 }
 0x231   : > { %2119 = vmatprep.subr.bf16.mxu1 %v2677_v35 }
 0x234   : > { %2120 = vmatpush3.bf16.msra.mxu1 %v2677_v35 }
 0x302   : > { %v2115_v49 = vpop.f32.mrb[8].mxu1 }
 0x303   : > { %v888_v50 = vmul.f32 0.17677669, %v2115_v49  ;;  %v871_v51 = vpop.f32.mrb[9].mxu1 }
 0x304   : > { %v886_v52 = vmul.f32 0.17677669, %v871_v51  ;;  %v2116_v53 = vpop.f32.mrb[10].mxu1 }
 0x305   : > { %v889_v54 = vmul.f32 0.17677669, %v2116_v53  ;;  %v874_v55 = vpop.f32.mrb[11].mxu1  ;;  %v896_v56 = vsel %vm824_vm0, %v888_v50, -inf }
 0x306   : > { %v887_v57 = vmul.f32 0.17677669, %v874_v55  ;;  %897 = vmax.xlane.f32.xlu1 %v896_v56  ;;  %v890_v58 = vsel %vm824_vm0, %v886_v52, -inf }
 0x307   : > { %891 = vmax.xlane.f32.xlu0 %v890_v58  ;;  %v899_v59 = vsel %vm824_vm0, %v889_v54, -inf }
 0x308   : > { %v893_v60 = vsel %vm824_vm0, %v887_v57, -inf }
 0x30a   : > { %900 = vmax.xlane.f32.xlu1 %v899_v59 }
 0x30b   : > { %894 = vmax.xlane.f32.xlu0 %v893_v60 }
 0x393   : > { %v898_v61 = vpop.xlane.xlu1 %897 }
 0x394   : > { %v904_v62 = vsub.f32 %v888_v50, %v898_v61  ;;  %v892_v63 = vpop.xlane.xlu0 %891 }
 0x395   : > { %v902_v0 = vsub.f32 %v886_v52, %v892_v63 }
 0x396   : > { %v910_v1 = vmul.f32 1.442695, %v904_v62 }
 0x397   : > { %v906_v2 = vmul.f32 1.442695, %v902_v0  ;;  %v901_v3 = vpop.xlane.xlu1 %900 }
 0x398   : > { %2316 = vpow2.f32 %v910_v1  ;;  %v905_v5 = vsub.f32 %v889_v54, %v901_v3  ;;  %v895_v8 = vpop.xlane.xlu0 %894 }
 0x399   : > { %v903_v9 = vsub.f32 %v887_v57, %v895_v8  ;;  %2318 = vpow2.f32 %v906_v2 }
 0x39a   : > { %v912_v10 = vmul.f32 1.442695, %v905_v5 }
 0x39b   : > { %v908_v11 = vmul.f32 1.442695, %v903_v9 }
 0x39d   : > { %2320 = vpow2.f32 %v908_v11 }
 0x39e   : > { %2322 = vpow2.f32 %v912_v10 }
 0x3a2   : > { %v2317_v12 = vpop.eup %2316 }
 0x3a3   : > { %v920_v13 = vsel %vm824_vm0, %v2317_v12, 0.0  ;;  %v2319_v14 = vpop.eup %2318 }
 0x3a4   : > { %921 = vadd.xlane.f32.xlu0 %v920_v13  ;;  %v914_v16 = vsel %vm824_vm0, %v2319_v14, 0.0 }
 0x3a7   : > { %v2321_v15 = vpop.eup %2320 }
 0x3a8   : > { %915 = vadd.xlane.f32.xlu0 %v914_v16  ;;  %v917_v17 = vsel %vm824_vm0, %v2321_v15, 0.0  ;;  %v2323_v18 = vpop.eup %2322 }
 0x3a9   : > { %918 = vadd.xlane.f32.xlu1 %v917_v17  ;;  %v923_v19 = vsel %vm824_vm0, %v2323_v18, 0.0 }
 0x3ad   : > { %924 = vadd.xlane.f32.xlu1 %v923_v19 }
 0x3be   : > { %999 = vrot.lane.b32.xlu0 %v2675_v34, %s2467_s24  ;;  %1001 = vrot.lane.b32.xlu1 %v2689_v47, %s2467_s24 }
 0x3c2   : > { %995 = vrot.lane.b32.xlu0 %v2687_v46, %s2467_s24  ;;  %993 = vrot.lane.b32.xlu1 %v2673_v31, %s2467_s24 }
 0x3c6   : > { %1177 = vrot.lane.b32.xlu0 %v2673_v31, %s2468_s25  ;;  %1181 = vrot.lane.b32.xlu1 %v2675_v34, %s2468_s25 }
 0x3ca   : > { %1183 = vrot.lane.b32.xlu1 %v2689_v47, %s2468_s25 }
 0x3ce   : > { %1179 = vrot.lane.b32.xlu1 %v2687_v46, %s2468_s25 }
 0x431   : > { %v922_v20 = vpop.xlane.xlu0 %921 }
 0x435   : > { %v916_v21 = vpop.xlane.xlu0 %915 }
 0x436   : > { %2324 = vrcp.f32 %v916_v21  ;;  %v919_v23 = vpop.xlane.xlu1 %918 }
 0x437   : > { %2326 = vrcp.f32 %v919_v23 }
 0x438   : > { %2328 = vrcp.f32 %v922_v20 }
 0x439   : > { %v1000_v24 = vpop.permute.xlu0 %999 }
 0x43a   : > { %v925_v25 = vpop.xlane.xlu1 %924  ;;  %2195 = vmatprep.subr.msk.bf16.mxu1 %vm824_vm0, %v1000_v24  ;;  %v1010_v43 = vsel %vm824_vm0, %v1000_v24, 0 }
 0x43b   : > { %2330 = vrcp.f32 %v925_v25 }
 0x43d   : > { %v996_v49 = vpop.permute.xlu0 %995 }
 0x43e   : > { %v1002_v37 = vpop.permute.xlu1 %1001 }
 0x43f   : > { %v1013_v45 = vsel %vm824_vm0, %v1002_v37, 0 }
 0x440   : > { %v2325_v26 = vpop.eup %2324 }
 0x441   : > { %v2327_v29 = vpop.eup %2326  ;;  %v930_v30 = vmul.f32 %v2325_v26, %v2319_v14  ;;  %v1178_v50 = vpop.permute.xlu0 %1177 }
 0x442   : > { %v931_v32 = vmul.f32 %v2327_v29, %v2321_v15  ;;  %v2329_v33 = vpop.eup %2328  ;;  %v994_v44 = vpop.permute.xlu1 %993 }
 0x443   : > { %v932_v40 = vmul.f32 %v2329_v33, %v2317_v12 }
 0x444   : > { %v934_v38 = vpack.c.bf16 %v931_v32, %v930_v30 }
 0x445   : > { %v2331_v39 = vpop.eup %2330 }
 0x446   : > { %v933_v41 = vmul.f32 %v2331_v39, %v2323_v18  ;;  %2121 = vmatprep.mubr.msk.bf16.mxu1 %vm824_vm0, %v934_v38  ;;  %v1182_v48 = vpop.permute.xlu1 %1181 }
 0x447   : > { %v1192_v51 = vsel %vm824_vm0, %v1182_v48, 0 }
 0x448   : > { %v935_v42 = vpack.c.bf16 %v933_v41, %v932_v40 }
 0x44a   : > { %2122 = vmatmul.mubr.msk.bf16.vlgmr.msra.gmra.mrb[12].mxu1 %vm824_vm0, %v935_v42  ;;  %v1184_v52 = vpop.permute.xlu1 %1183 }
 0x44b   : > { %2126 = vmatpush3.bf16.xpose.msra.mxu1 %v1010_v43  ;;  %2129 = vmatprep.mubr.msk.bf16.mxu1 %vm824_vm0, %v994_v44  ;;  %v1195_v53 = vsel %vm824_vm0, %v1184_v52, 0 }
 0x44c   : > { %2196 = vmatprep.subr.msk.bf16.mxu1 %vm824_vm0, %v1002_v37 }
 0x44e   : > { %v1180_v54 = vpop.permute.xlu1 %1179 }
 0x453   : > { %2128 = vmatpush3.bf16.xpose.msra.mxu1 %v1013_v45 }
 0x454   : > { %2197 = vmatprep.subr.msk.bf16.mxu1 %vm824_vm0, %v1182_v48 }
 0x45a   : > { %2130 = vmatmul.mubr.msk.bf16.vlgmr.msra.gmra.mrb[16].mxu1 %vm824_vm0, %v996_v49 }
 0x45b   : > { %2142 = vmatpush3.bf16.xpose.msra.mxu1 %v1192_v51  ;;  %2145 = vmatprep.mubr.msk.bf16.mxu1 %vm824_vm0, %v1178_v50 }
 0x45c   : > { %2198 = vmatprep.subr.msk.bf16.mxu1 %vm824_vm0, %v1184_v52 }
 0x463   : > { %2144 = vmatpush3.bf16.xpose.msra.mxu1 %v1195_v53 }
 0x46a   : > { %2146 = vmatmul.mubr.msk.bf16.vlgmr.msra.gmra.mrb[20].mxu1 %vm824_vm0, %v1180_v54 }
 0x51d   : > { %v2739_v55 = vpop.f32.mrb[12].mxu1 }
 0x51e   : > { %v2741_v56 = vpop.f32.mrb[13].mxu1 }
 0x51f   : > { %v2743_v57 = vpop.f32.mrb[14].mxu1 }
 0x520   : > { %v2745_v58 = vpop.f32.mrb[15].mxu1 }
 0x52d   : > { %v2131_v59 = vpop.f32.mrb[16].mxu1 }
 0x52e   : > { %v1049_v60 = vpop.f32.mrb[17].mxu1  ;;  %v2767_v42 = vmul.f32 0.17677669, %v2131_v59 }
 0x52f   : > { %v2132_v61 = vpop.f32.mrb[18].mxu1  ;;  %v1064_v41 = vmul.f32 0.17677669, %v1049_v60 }
 0x530   : > { %v1052_v62 = vpop.f32.mrb[19].mxu1  ;;  %v2770_v44 = vmul.f32 0.17677669, %v2132_v61  ;;  %v1074_v45 = vsel %vm824_vm0, %v2767_v42, -inf }
 0x531   : > { %v1068_v43 = vsel %vm824_vm0, %v1064_v41, -inf }
 0x53d   : > { %v2147_v63 = vpop.f32.mrb[20].mxu1 }
 0x53e   : > { %v1231_v0 = vpop.f32.mrb[21].mxu1  ;;  %v1248_v5 = vmul.f32 0.17677669, %v2147_v63 }
 0x53f   : > { %v1246_v1 = vmul.f32 0.17677669, %v1231_v0  ;;  %v2148_v2 = vpop.f32.mrb[22].mxu1 }
 0x540   : > { %v1234_v3 = vpop.f32.mrb[23].mxu1  ;;  %v1249_v11 = vmul.f32 0.17677669, %v2148_v2  ;;  %v1256_v12 = vsel %vm824_vm0, %v1248_v5, -inf }
 0x541   : > { %v1247_v8 = vmul.f32 0.17677669, %v1234_v3  ;;  %v1250_v9 = vsel %vm824_vm0, %v1246_v1, -inf }
 0x542   : > { %1251 = vmax.xlane.f32.xlu0 %v1250_v9  ;;  %v1259_v13 = vsel %vm824_vm0, %v1249_v11, -inf }
 0x543   : > { %v1253_v10 = vsel %vm824_vm0, %v1247_v8, -inf }
 0x544   : > { %1254 = vmax.xlane.f32.xlu1 %v1253_v10 }
 0x546   : > { %1257 = vmax.xlane.f32.xlu0 %v1256_v12 }
 0x54a   : > { %1260 = vmax.xlane.f32.xlu0 %v1259_v13 }
 0x555   : > { %1298 = vrot.lane.b32.xlu1 %v2677_v35, %s2468_s25 }
 0x5cf   : > { %v1252_v14 = vpop.xlane.xlu0 %1251 }
 0x5d0   : > { %v1262_v15 = vsub.f32 %v1246_v1, %v1252_v14 }
 0x5d1   : > { %v1255_v16 = vpop.xlane.xlu1 %1254 }
 0x5d2   : > { %v1266_v19 = vmul.f32 1.442695, %v1262_v15  ;;  %v1263_v20 = vsub.f32 %v1247_v8, %v1255_v16 }
 0x5d3   : > { %v1258_v17 = vpop.xlane.xlu0 %1257 }
 0x5d4   : > { %v1264_v18 = vsub.f32 %v1248_v5, %v1258_v17  ;;  %v1268_v25 = vmul.f32 1.442695, %v1263_v20 }
 0x5d6   : > { %v1270_v21 = vmul.f32 1.442695, %v1264_v18 }
 0x5d7   : > { %v1261_v23 = vpop.xlane.xlu0 %1260 }
 0x5d8   : > { %2332 = vpow2.f32 %v1270_v21  ;;  %v1265_v24 = vsub.f32 %v1249_v11, %v1261_v23 }
 0x5d9   : > { %2334 = vpow2.f32 %v1266_v19 }
 0x5da   : > { %v1272_v26 = vmul.f32 1.442695, %v1265_v24 }
 0x5dc   : > { %2336 = vpow2.f32 %v1272_v26 }
 0x5dd   : > { %2338 = vpow2.f32 %v1268_v25 }
 0x5e2   : > { %v2333_v29 = vpop.eup %2332 }
 0x5e3   : > { %v1280_v30 = vsel %vm824_vm0, %v2333_v29, 0.0  ;;  %v2335_v32 = vpop.eup %2334 }
 0x5e4   : > { %1281 = vadd.xlane.f32.xlu0 %v1280_v30  ;;  %v1274_v37 = vsel %vm824_vm0, %v2335_v32, 0.0 }
 0x5e6   : > { %v2337_v33 = vpop.eup %2336 }
 0x5e7   : > { %v1283_v38 = vsel %vm824_vm0, %v2337_v33, 0.0  ;;  %v2339_v39 = vpop.eup %2338 }
 0x5e8   : > { %1275 = vadd.xlane.f32.xlu0 %v1274_v37  ;;  %1284 = vadd.xlane.f32.xlu1 %v1283_v38  ;;  %v1277_v40 = vsel %vm824_vm0, %v2339_v39, 0.0 }
 0x5ec   : > { %1278 = vadd.xlane.f32.xlu1 %v1277_v40 }
 0x5fd   : > { %1361 = vrot.lane.b32.xlu1 %v2675_v34, %s2469_s15  ;;  %v1065_v34 = vmul.f32 0.17677669, %v1052_v62 }
 0x5fe   : > { %1296 = vrot.lane.b32.xlu0 %v2679_v36, %s2468_s25 }
 0x601   : > { %1363 = vrot.lane.b32.xlu1 %v2689_v47, %s2469_s15  ;;  %v1077_v47 = vsel %vm824_vm0, %v2770_v44, -inf }
 0x602   : > { %1357 = vrot.lane.b32.xlu0 %v2673_v31, %s2469_s15  ;;  %v1071_v31 = vsel %vm824_vm0, %v1065_v34, -inf }
 0x605   : > { %1359 = vrot.lane.b32.xlu1 %v2687_v46, %s2469_s15  ;;  %v1299_v46 = vpop.permute.xlu1 %1298 }
 0x621   : > { %1069 = vmax.xlane.f32.xlu0 %v1068_v43 }
 0x625   : > { %1075 = vmax.xlane.f32.xlu0 %v1074_v45 }
 0x629   : > { %1078 = vmax.xlane.f32.xlu0 %v1077_v47  ;;  %1072 = vmax.xlane.f32.xlu1 %v1071_v31 }
 0x671   : > { %v1282_v48 = vpop.xlane.xlu0 %1281 }
 0x675   : > { %v1276_v49 = vpop.xlane.xlu0 %1275  ;;  %v1285_v50 = vpop.xlane.xlu1 %1284 }
 0x676   : > { %2340 = vrcp.f32 %v1285_v50 }
 0x677   : > { %2342 = vrcp.f32 %v1276_v49 }
 0x678   : > { %2344 = vrcp.f32 %v1282_v48 }
 0x679   : > { %v1297_v51 = vpop.permute.xlu0 %1296  ;;  %v1279_v52 = vpop.xlane.xlu1 %1278 }
 0x67a   : > { %2346 = vrcp.f32 %v1279_v52  ;;  %2149 = vmatprep.subr.bf16.mxu1 %v1297_v51 }
 0x67b   : > { %2150 = vmatpush3.bf16.msra.mxu1 %v1297_v51 }
 0x67c   : > { %2151 = vmatprep.subr.bf16.mxu1 %v1299_v46 }
 0x67d   : > { %v1362_v53 = vpop.permute.xlu1 %1361  ;;  %v1358_v5 = vpop.permute.xlu0 %1357 }
 0x67e   : > { %v1372_v8 = vsel %vm824_vm0, %v1362_v53, 0 }
 0x67f   : > { %2152 = vmatpush3.bf16.msra.mxu1 %v1299_v46 }
 0x680   : > { %2199 = vmatprep.subr.msk.bf16.mxu1 %vm824_vm0, %v1362_v53  ;;  %v2341_v54 = vpop.eup %2340 }
 0x681   : > { %v2343_v59 = vpop.eup %2342  ;;  %v1293_v62 = vmul.f32 %v2341_v54, %v2337_v33  ;;  %v1364_v9 = vpop.permute.xlu1 %1363 }
 0x682   : > { %v2345_v60 = vpop.eup %2344  ;;  %v1290_v63 = vmul.f32 %v2343_v59, %v2335_v32  ;;  %v1375_v10 = vsel %vm824_vm0, %v1364_v9, 0 }
 0x683   : > { %v1292_v1 = vmul.f32 %v2345_v60, %v2333_v29 }
 0x684   : > { %v2347_v61 = vpop.eup %2346 }
 0x685   : > { %v1291_v0 = vmul.f32 %v2347_v61, %v2339_v39  ;;  %v1295_v3 = vpack.c.bf16 %v1293_v62, %v1292_v1  ;;  %v1360_v11 = vpop.permute.xlu1 %1359 }
 0x687   : > { %v1294_v2 = vpack.c.bf16 %v1291_v0, %v1290_v63 }
 0x689   : > { %2153 = vmatprep.mubr.msk.bf16.mxu1 %vm824_vm0, %v1294_v2 }
 0x68a   : > { %2154 = vmatmul.mubr.msk.bf16.vlgmr.msra.gmra.mrb[24].mxu1 %vm824_vm0, %v1295_v3 }
 0x68b   : > { %2158 = vmatpush3.bf16.xpose.msra.mxu1 %v1372_v8  ;;  %2161 = vmatprep.mubr.msk.bf16.mxu1 %vm824_vm0, %v1358_v5 }
 0x68c   : > { %2200 = vmatprep.subr.msk.bf16.mxu1 %vm824_vm0, %v1364_v9 }
 0x693   : > { %2160 = vmatpush3.bf16.xpose.msra.mxu1 %v1375_v10 }
 0x69a   : > { %2162 = vmatmul.mubr.msk.bf16.vlgmr.msra.gmra.mrb[28].mxu1 %vm824_vm0, %v1360_v11 }
 0x6ae   : > { %v1070_v12 = vpop.xlane.xlu0 %1069 }
 0x6af   : > { %v1080_v21 = vsub.f32 %v1064_v41, %v1070_v12 }
 0x6b1   : > { %v1084_v25 = vmul.f32 1.442695, %v1080_v21 }
 0x6b2   : > { %v1076_v18 = vpop.xlane.xlu0 %1075 }
 0x6b3   : > { %v1082_v26 = vsub.f32 %v2767_v42, %v1076_v18  ;;  %2348 = vpow2.f32 %v1084_v25 }
 0x6b5   : > { %v1088_v32 = vmul.f32 1.442695, %v1082_v26 }
 0x6b6   : > { %v1073_v20 = vpop.xlane.xlu1 %1072  ;;  %v1079_v24 = vpop.xlane.xlu0 %1078 }
 0x6b7   : > { %v1081_v23 = vsub.f32 %v1065_v34, %v1073_v20  ;;  %v1083_v29 = vsub.f32 %v2770_v44, %v1079_v24 }
 0x6b9   : > { %v1086_v30 = vmul.f32 1.442695, %v1081_v23  ;;  %v1090_v37 = vmul.f32 1.442695, %v1083_v29 }
 0x6bb   : > { %2350 = vpow2.f32 %v1086_v30 }
 0x6bc   : > { %2352 = vpow2.f32 %v1088_v32 }
 0x6bd   : > { %2354 = vpow2.f32 %v1090_v37  ;;  %v2349_v31 = vpop.eup %2348 }
 0x6be   : > { %v1092_v49 = vsel %vm824_vm0, %v2349_v31, 0.0 }
 0x6c5   : > { %v2351_v48 = vpop.eup %2350 }
 0x6c6   : > { %v2804_v50 = vpop.eup %2352  ;;  %v1095_v51 = vsel %vm824_vm0, %v2351_v48, 0.0 }
 0x6c7   : > { %v2807_v52 = vpop.eup %2354  ;;  %v1098_v53 = vsel %vm824_vm0, %v2804_v50, 0.0 }
 0x6c8   : > { %v1101_v54 = vsel %vm824_vm0, %v2807_v52, 0.0 }
 0x75d   : > { %v2785_v13 = vpop.f32.mrb[24].mxu1 }
 0x75e   : > { %v2787_v14 = vpop.f32.mrb[25].mxu1 }
 0x75f   : > { %v2789_v15 = vpop.f32.mrb[26].mxu1 }
 0x760   : > { %v2253_v16 = vpack.i.bf16 %v2789_v15, %v2785_v13  ;;  %v2793_v17 = vpop.f32.mrb[27].mxu1 }
 0x761   : > { %v2248_v19 = vpack.i.bf16 %v2793_v17, %v2787_v14 }
 0x76d   : > { %v2163_v33 = vpop.f32.mrb[28].mxu1 }
 0x76e   : > { %v1411_v38 = vpop.f32.mrb[29].mxu1  ;;  %v1428_v45 = vmul.f32 0.17677669, %v2163_v33 }
 0x76f   : > { %v1426_v39 = vmul.f32 0.17677669, %v1411_v38  ;;  %v2164_v40 = vpop.f32.mrb[30].mxu1 }
 0x770   : > { %v1414_v43 = vpop.f32.mrb[31].mxu1  ;;  %v1429_v42 = vmul.f32 0.17677669, %v2164_v40  ;;  %v1436_v47 = vsel %vm824_vm0, %v1428_v45, -inf }
 0x771   : > { %v1427_v41 = vmul.f32 0.17677669, %v1414_v43  ;;  %v1430_v34 = vsel %vm824_vm0, %v1426_v39, -inf }
 0x772   : > { %1431 = vmax.xlane.f32.xlu0 %v1430_v34  ;;  %v1439_v46 = vsel %vm824_vm0, %v1429_v42, -inf }
 0x773   : > { %v1433_v44 = vsel %vm824_vm0, %v1427_v41, -inf }
 0x774   : > { %1434 = vmax.xlane.f32.xlu1 %v1433_v44 }
 0x776   : > { %1437 = vmax.xlane.f32.xlu0 %v1436_v47 }
 0x778   : > { %1440 = vmax.xlane.f32.xlu1 %v1439_v46 }
 0x77a   : > { %1093 = vadd.xlane.f32.xlu0 %v1092_v49 }
 0x77c   : > { %1096 = vadd.xlane.f32.xlu1 %v1095_v51 }
 0x77e   : > { %1099 = vadd.xlane.f32.xlu0 %v1098_v53 }
 0x780   : > { %1102 = vadd.xlane.f32.xlu1 %v1101_v54 }
 0x791   : > { %1118 = vrot.lane.b32.xlu1 %v2677_v35, %s2467_s24 }
 0x795   : > { %1476 = vrot.lane.b32.xlu1 %v2679_v36, %s2469_s15 }
 0x7ff   : > { %v1432_v59 = vpop.xlane.xlu0 %1431 }
 0x800   : > { %v1442_v60 = vsub.f32 %v1426_v39, %v1432_v59 }
 0x801   : > { %v1435_v61 = vpop.xlane.xlu1 %1434 }
 0x802   : > { %v1446_v62 = vmul.f32 1.442695, %v1442_v60  ;;  %v1443_v0 = vsub.f32 %v1427_v41, %v1435_v61 }
 0x803   : > { %v1438_v63 = vpop.xlane.xlu0 %1437 }
 0x804   : > { %v1444_v1 = vsub.f32 %v1428_v45, %v1438_v63  ;;  %2356 = vpow2.f32 %v1446_v62  ;;  %v1448_v9 = vmul.f32 1.442695, %v1443_v0  ;;  %v2308_v63 = vld [vmem:[#allocation4] sm:$0xff]   ;;  %v2309_v0 = vld [vmem:[#allocation4 + $0x8] sm:$0xff]  }
 0x805   : > { %v1441_v2 = vpop.xlane.xlu1 %1440 }
 0x806   : > { %v1450_v3 = vmul.f32 1.442695, %v1444_v1  ;;  %v1445_v5 = vsub.f32 %v1429_v42, %v1441_v2  ;;  %v2310_v1 = vld [vmem:[#allocation4 + $0x10] sm:$0xff]   ;;  %v2311_v2 = vld [vmem:[#allocation4 + $0x18] sm:$0xff]  }
 0x807   : > { %v1094_v8 = vpop.xlane.xlu0 %1093 }
 0x808   : > { %2358 = vpow2.f32 %v1450_v3  ;;  %v1452_v10 = vmul.f32 1.442695, %v1445_v5  ;;  %v2312_v3 = vld [vmem:[#allocation4 + $0x20] sm:$0xff]   ;;  %v2313_v5 = vld [vmem:[#allocation4 + $0x28] sm:$0xff]  }
 0x809   : > { %2360 = vrcp.f32 %v1094_v8  ;;  %v1097_v11 = vpop.xlane.xlu1 %1096  ;;  %v2314_v8 = vld [vmem:[#allocation4 + $0x30] sm:$0xff]  }
 0x80a   : > { %2362 = vpow2.f32 %v1452_v10 }
 0x80b   : > { %2364 = vrcp.f32 %v1097_v11  ;;  %v1100_v40 = vpop.xlane.xlu0 %1099 }
 0x80c   : > { %2366 = vpow2.f32 %v1448_v9 }
 0x80d   : > { %v1103_v38 = vpop.xlane.xlu1 %1102 }
 0x80e   : > { %v2357_v12 = vpop.eup %2356  ;;  %2368 = vrcp.f32 %v1103_v38 }
 0x80f   : > { %v1454_v32 = vsel %vm824_vm0, %v2357_v12, 0.0  ;;  %2370 = vrcp.f32 %v1100_v40 }
 0x811   : > { %v1119_v39 = vpop.permute.xlu1 %1118 }
 0x812   : > { %v2359_v18 = vpop.eup %2358 }
 0x813   : > { %v2361_v20 = vpop.eup %2360  ;;  %v1460_v21 = vsel %vm824_vm0, %v2359_v18, 0.0 }
 0x814   : > { %v2363_v23 = vpop.eup %2362  ;;  %1461 = vadd.xlane.f32.xlu0 %v1460_v21  ;;  %v1108_v29 = vmul.f32 %v2361_v20, %v2349_v31 }
 0x815   : > { %v2365_v24 = vpop.eup %2364  ;;  %v1463_v25 = vsel %vm824_vm0, %v2363_v23, 0.0  ;;  %v1477_v43 = vpop.permute.xlu1 %1476 }
 0x816   : > { %v2367_v26 = vpop.eup %2366  ;;  %1464 = vadd.xlane.f32.xlu1 %v1463_v25  ;;  %v1109_v30 = vmul.f32 %v2365_v24, %v2351_v48 }
 0x817   : > { %v1457_v37 = vsel %vm824_vm0, %v2367_v26, 0.0 }
 0x818   : > { %1455 = vadd.xlane.f32.xlu0 %v1454_v32  ;;  %v1112_v33 = vpack.c.bf16 %v1109_v30, %v1108_v29  ;;  %v2369_v44 = vpop.eup %2368 }
 0x81a   : > { %2137 = vmatprep.mubr.msk.bf16.mxu0 %vm824_vm0, %v1112_v33  ;;  %1458 = vadd.xlane.f32.xlu1 %v1457_v37 }
 0x82b   : > { %1478 = vrot.lane.b32.xlu1 %v2677_v35, %s2469_s15  ;;  %v2371_v35 = vpop.eup %2370 }
 0x82c   : > { %v1110_v31 = vmul.f32 %v2371_v35, %v2804_v50 }
 0x82e   : > { %1116 = vrot.lane.b32.xlu0 %v2679_v36, %s2467_s24  ;;  %v1111_v36 = vmul.f32 %v2369_v44, %v2807_v52 }
 0x830   : > { %v1113_v48 = vpack.c.bf16 %v1111_v36, %v1110_v31 }
 0x8a1   : > { %v1462_v45 = vpop.xlane.xlu0 %1461 }
 0x8a3   : > { %v1465_v41 = vpop.xlane.xlu1 %1464 }
 0x8a5   : > { %v1456_v34 = vpop.xlane.xlu0 %1455 }
 0x8a6   : > { %2372 = vrcp.f32 %v1456_v34 }
 0x8a7   : > { %2374 = vrcp.f32 %v1465_v41  ;;  %v1459_v42 = vpop.xlane.xlu1 %1458 }
 0x8a8   : > { %2376 = vrcp.f32 %v1459_v42 }
 0x8a9   : > { %2378 = vrcp.f32 %v1462_v45  ;;  %v1117_v47 = vpop.permute.xlu0 %1116 }
 0x8aa   : > { %2133 = vmatprep.subr.bf16.mxu0 %v1117_v47 }
 0x8ab   : > { %2134 = vmatpush3.bf16.msra.mxu0 %v1117_v47  ;;  %v1479_v54 = vpop.permute.xlu1 %1478 }
 0x8ac   : > { %2135 = vmatprep.subr.bf16.mxu0 %v1119_v39 }
 0x8af   : > { %2136 = vmatpush3.bf16.msra.mxu0 %v1119_v39 }
 0x8b0   : > { %v2373_v46 = vpop.eup %2372  ;;  %2165 = vmatprep.subr.bf16.mxu0 %v1477_v43 }
 0x8b1   : > { %v2375_v49 = vpop.eup %2374  ;;  %v1470_v59 = vmul.f32 %v2373_v46, %v2357_v12  ;;  %v2315_v12 = vld [vmem:[#allocation4 + $0x38] sm:$0xff]  }
 0x8b2   : > { %v2377_v51 = vpop.eup %2376  ;;  %2138 = vmatmul.mubr.msk.bf16.vlgmr.msra.gmra.mrb[8].mxu0 %vm824_vm0, %v1113_v48  ;;  %v1473_v61 = vmul.f32 %v2375_v49, %v2363_v23 }
 0x8b3   : > { %v2379_v53 = vpop.eup %2378  ;;  %2166 = vmatpush3.bf16.msra.mxu0 %v1477_v43  ;;  %v1471_v60 = vmul.f32 %v2377_v51, %v2367_v26 }
 0x8b4   : > { %2167 = vmatprep.subr.bf16.mxu0 %v1479_v54  ;;  %v1472_v52 = vmul.f32 %v2379_v53, %v2359_v18 }
 0x8b5   : > { %v1474_v62 = vpack.c.bf16 %v1471_v60, %v1470_v59  ;;  %v1955_v59 = vld [vmem:[%s2891_s7] ss:$0 sm:$0xff] }
 0x8b6   : > { %v1475_v50 = vpack.c.bf16 %v1473_v61, %v1472_v52 }
 0x8b7   : > { %2168 = vmatpush3.bf16.msra.mxu0 %v1479_v54  ;;  %2169 = vmatprep.mubr.msk.bf16.mxu0 %vm824_vm0, %v1474_v62 }
 0x8b8   : > { %2173 = vmatprep.subr.bf16.mxu0 %v2308_v63 }
 0x8ba   : > { %2170 = vmatmul.mubr.msk.bf16.vlgmr.msra.gmra.mrb[12].mxu0 %vm824_vm0, %v1475_v50 }
 0x8bb   : > { %2174 = vmatpush3.bf16.msra.mxu0 %v2308_v63 }
 0x8bc   : > { %2175 = vmatprep.subr.bf16.mxu0 %v2309_v0 }
 0x8bf   : > { %2176 = vmatpush3.bf16.msra.mxu0 %v2309_v0 }
 0x8c0   : > { %2177 = vmatprep.subr.bf16.mxu0 %v2310_v1 }
 0x8c3   : > { %2178 = vmatpush3.bf16.msra.mxu0 %v2310_v1 }
 0x8c4   : > { %2179 = vmatprep.subr.bf16.mxu0 %v2311_v2 }
 0x8c7   : > { %2180 = vmatpush3.bf16.msra.mxu0 %v2311_v2 }
 0x8c8   : > { %2181 = vmatprep.subr.bf16.mxu0 %v2312_v3 }
 0x8cb   : > { %2182 = vmatpush3.bf16.msra.mxu0 %v2312_v3 }
 0x8cc   : > { %2183 = vmatprep.subr.bf16.mxu0 %v2313_v5 }
 0x8cf   : > { %2184 = vmatpush3.bf16.msra.mxu0 %v2313_v5 }
 0x8d0   : > { %2185 = vmatprep.subr.bf16.mxu0 %v2314_v8 }
 0x8d3   : > { %2186 = vmatpush3.bf16.msra.mxu0 %v2314_v8 }
 0x8d4   : > { %2187 = vmatprep.subr.bf16.mxu0 %v2315_v12 }
 0x8d7   : > { %2188 = vmatpush3.bf16.msra.mxu0 %v2315_v12 }
 0x985   : > { %v2139_v9 = vpop.f32.mrb[8].mxu0 }
 0x986   : > { %v1162_v10 = vpop.f32.mrb[9].mxu0 }
 0x987   : > { %v2140_v11 = vpop.f32.mrb[10].mxu0 }
 0x988   : > { %v2243_v18 = vpack.i.bf16 %v2140_v11, %v2139_v9  ;;  %v1165_v20 = vpop.f32.mrb[11].mxu0 }
 0x989   : > { %v2238_v21 = vpack.i.bf16 %v1165_v20, %v1162_v10 }
 0x98a   : > { %2244 = vrot.lane.b32.xlu1 %v2243_v18, %s2469_s15 }
 0x98b   : > { %2239 = vrot.lane.b32.xlu0 %v2238_v21, %s2469_s15 }
 0x98d   : > { %v2171_v23 = vpop.f32.mrb[12].mxu0 }
 0x98e   : > { %2254 = vrot.lane.b32.xlu1 %v2253_v16, %s2468_s25  ;;  %v1522_v24 = vpop.f32.mrb[13].mxu0 }
 0x98f   : > { %2249 = vrot.lane.b32.xlu0 %v2248_v19, %s2468_s25  ;;  %v2172_v25 = vpop.f32.mrb[14].mxu0 }
 0x990   : > { %v2263_v26 = vpack.i.bf16 %v2172_v25, %v2171_v23  ;;  %v1525_v29 = vpop.f32.mrb[15].mxu0 }
 0x991   : > { %v2258_v30 = vpack.i.bf16 %v1525_v29, %v1522_v24 }
 0x992   : > { %2264 = vrot.lane.b32.xlu1 %v2263_v26, %s2467_s24 }
 0x993   : > { %2259 = vrot.lane.b32.xlu0 %v2258_v30, %s2467_s24 }
 0x9fc   : > { %v2245_v32 = vpop.permute.xlu1 %2244 }
 0x9fd   : > { %v2240_v33 = vpop.permute.xlu0 %2239  ;;  %v2247_v37 = vunpack.i.h.bf16 %v2245_v32  ;;  %v2246_v38 = vunpack.i.l.bf16 %v2245_v32 }
 0x9fe   : > { %v2242_v15 = vunpack.i.h.bf16 %v2240_v33  ;;  %v2241_v16 = vunpack.i.l.bf16 %v2240_v33 }
 0x9ff   : > { %v1588_v19 = vsel %vm824_vm0, %v2743_v57, %v2247_v37  ;;  %v1587_v45 = vsel %vm824_vm0, %v2739_v55, %v2246_v38 }
 0xa00   : > { %v2255_v13 = vpop.permute.xlu1 %2254  ;;  %v1586_v34 = vsel %vm824_vm0, %v2745_v58, %v2242_v15  ;;  %v1585_v42 = vsel %vm824_vm0, %v2741_v56, %v2241_v16 }
 0xa01   : > { %v2250_v39 = vpop.permute.xlu0 %2249  ;;  %v2257_v40 = vunpack.i.h.bf16 %v2255_v13  ;;  %v2256_v43 = vunpack.i.l.bf16 %v2255_v13 }
 0xa02   : > { %v2252_v14 = vunpack.i.h.bf16 %v2250_v39  ;;  %v2251_v17 = vunpack.i.l.bf16 %v2250_v39 }
 0xa03   : > { %v1592_v36 = vsel %vm1589_vm1, %v1587_v45, %v2256_v43  ;;  %v1593_v31 = vsel %vm1589_vm1, %v1588_v19, %v2257_v40 }
 0xa04   : > { %v2265_v41 = vpop.permute.xlu1 %2264  ;;  %v1590_v48 = vsel %vm1589_vm1, %v1585_v42, %v2251_v17  ;;  %v1591_v55 = vsel %vm1589_vm1, %v1586_v34, %v2252_v14 }
 0xa05   : > { %v2267_v44 = vunpack.i.h.bf16 %v2265_v41  ;;  %v2266_v47 = vunpack.i.l.bf16 %v2265_v41  ;;  %v2260_v35 = vpop.permute.xlu0 %2259  ;;  %v1964_v41 = vld [vmem:[%s2892_s8] ss:$0 sm:$0xff] }
 0xa06   : > { %v2262_v46 = vunpack.i.h.bf16 %v2260_v35  ;;  %v2261_v57 = vunpack.i.l.bf16 %v2260_v35 }
 0xa07   : > { %v1597_v49 = vsel %vm1594_vm2, %v1592_v36, %v2266_v47  ;;  %v1598_v58 = vsel %vm1594_vm2, %v1593_v31, %v2267_v44  ;;  %v1965_v36 = vld [vmem:[%s2893_s9] ss:$0 sm:$0xff] }
 0xa08   : > { %v1600_v51 = vpack.c.bf16 %v1598_v58, %v1597_v49  ;;  %v1595_v56 = vsel %vm1594_vm2, %v1590_v48, %v2261_v57  ;;  %v1596_v53 = vsel %vm1594_vm2, %v1591_v55, %v2262_v46 }
 0xa09   : > { %v1599_v54 = vpack.c.bf16 %v1596_v53, %v1595_v56 }
 0xa0b   : > { %2189 = vmatprep.mubr.bf16.mxu0 %v1599_v54 }
 0xa0c   : > { %2190 = vmatmul.mubr.bf16.vlgmr.msra.gmra.mrb[16].mxu0 %v1600_v51 }
 0xadf   : > { %v2191_v60 = vpop.f32.mrb[16].mxu0 }
 0xae0   : > { %v1706_v61 = vpop.f32.mrb[17].mxu0  ;;  %v1715_v62 = vadd.f32 %v2191_v60, %v1955_v59 }
 0xae1   : > { %v1707_v52 = vadd.f32 %v1955_v59, %v1706_v61  ;;  %v2192_v50 = vpop.f32.mrb[18].mxu0 }
 0xae2   : > { %v1709_v63 = vpop.f32.mrb[19].mxu0  ;;  %v1723_v2 = vmax.f32 %v1715_v62, 0.0  ;;  %v1718_v3 = vadd.f32 %v2192_v50, %v1955_v59 }
 0xae3   : > { %v1721_v0 = vmax.f32 %v1707_v52, 0.0  ;;  %v1710_v1 = vadd.f32 %v1955_v59, %v1709_v63 }
 0xae4   : > { %v1724_v10 = vmax.f32 %v1718_v3, 0.0  ;;  %v1727_v11 = vadd.f32 %v1984_v27, %v1723_v2 }
 0xae5   : > { %v1722_v5 = vmax.f32 %v1710_v1, 0.0  ;;  %v1725_v8 = vadd.f32 %v1980_v6, %v1721_v0 }
 0xae6   : > { %v1728_v12 = vadd.f32 %v1985_v28, %v1724_v10 }
 0xae7   : > { %1729 = vadd.xlane.f32.xlu0 %v1725_v8  ;;  %v1726_v9 = vadd.f32 %v1981_v7, %v1722_v5 }
 0xae9   : > { %1731 = vadd.xlane.f32.xlu1 %v1726_v9 }
 0xaeb   : > { %1733 = vadd.xlane.f32.xlu0 %v1727_v11 }
 0xaef   : > { %1735 = vadd.xlane.f32.xlu0 %v1728_v12 }
 0xb74   : > { %v1730_v18 = vpop.xlane.xlu0 %1729 }
 0xb75   : > { %v1738_v20 = vmul.f32 0.0078125, %v1730_v18 }
 0xb76   : > { %v1732_v21 = vpop.xlane.xlu1 %1731 }
 0xb77   : > { %v1742_v23 = vsub.f32 %v1725_v8, %v1738_v20  ;;  %v1739_v24 = vmul.f32 0.0078125, %v1732_v21 }
 0xb78   : > { %v1734_v6 = vpop.xlane.xlu0 %1733 }
 0xb79   : > { %v1743_v25 = vsub.f32 %v1726_v9, %v1739_v24  ;;  %v1740_v26 = vmul.f32 0.0078125, %v1734_v6  ;;  %v1746_v4 = vmul.f32 %v1742_v23, %v1742_v23 }
 0xb7b   : > { %v1744_v7 = vsub.f32 %v1727_v11, %v1740_v26  ;;  %1750 = vadd.xlane.f32.xlu0 %v1746_v4  ;;  %v1747_v29 = vmul.f32 %v1743_v25, %v1743_v25 }
 0xb7c   : > { %v1736_v30 = vpop.xlane.xlu0 %1735 }
 0xb7d   : > { %v1741_v32 = vmul.f32 0.0078125, %v1736_v30  ;;  %1752 = vadd.xlane.f32.xlu1 %v1747_v29  ;;  %v1748_v27 = vmul.f32 %v1744_v7, %v1744_v7 }
 0xb7f   : > { %v1745_v33 = vsub.f32 %v1728_v12, %v1741_v32  ;;  %1754 = vadd.xlane.f32.xlu0 %v1748_v27 }
 0xb81   : > { %v1749_v22 = vmul.f32 %v1745_v33, %v1745_v33 }
 0xb83   : > { %1756 = vadd.xlane.f32.xlu1 %v1749_v22 }
 0xc08   : > { %v1751_v28 = vpop.xlane.xlu0 %1750 }
 0xc09   : > { %v1758_v37 = vmul.f32 0.0078125, %v1751_v28 }
 0xc0a   : > { %v1753_v38 = vpop.xlane.xlu1 %1752 }
 0xc0b   : > { %v1762_v13 = vadd.f32 1e-05, %v1758_v37  ;;  %v1759_v15 = vmul.f32 0.0078125, %v1753_v38 }
 0xc0c   : > { %v1755_v16 = vpop.xlane.xlu0 %1754 }
 0xc0d   : > { %2380 = vrsqrt.f32 %v1762_v13  ;;  %v1763_v39 = vadd.f32 1e-05, %v1759_v15  ;;  %v1760_v40 = vmul.f32 0.0078125, %v1755_v16 }
 0xc0f   : > { %2382 = vrsqrt.f32 %v1763_v39  ;;  %v1764_v43 = vadd.f32 1e-05, %v1760_v40 }
 0xc10   : > { %v1757_v14 = vpop.xlane.xlu1 %1756 }
 0xc11   : > { %2384 = vrsqrt.f32 %v1764_v43  ;;  %v1761_v17 = vmul.f32 0.0078125, %v1757_v14 }
 0xc13   : > { %v1765_v19 = vadd.f32 1e-05, %v1761_v17 }
 0xc15   : > { %2386 = vrsqrt.f32 %v1765_v19 }
 0xc17   : > { %v2381_v45 = vpop.eup %2380 }
 0xc18   : > { %v1770_v34 = vmul.f32 %v2381_v45, %v1742_v23 }
 0xc19   : > { %v2383_v42 = vpop.eup %2382 }
 0xc1a   : > { %v1781_v44 = vmul.f32 %v1964_v41, %v1770_v34  ;;  %v1771_v47 = vmul.f32 %v2383_v42, %v1743_v25 }
 0xc1b   : > { %v2385_v35 = vpop.eup %2384 }
 0xc1c   : > { %v1782_v31 = vmul.f32 %v1964_v41, %v1771_v47  ;;  %v1772_v46 = vmul.f32 %v2385_v35, %v1744_v7  ;;  %v1792_v57 = vadd.f32 %v1965_v36, %v1781_v44 }
 0xc1e   : > { %v1793_v48 = vadd.f32 %v1965_v36, %v1782_v31  ;;  %v1783_v58 = vmul.f32 %v1964_v41, %v1772_v46 }
 0xc1f   : > { %v2387_v55 = vpop.eup %2386 }
 0xc20   : > { %v1997_v49 = vpack.c.bf16 %v1793_v48, %v1792_v57  ;;  %v1773_v51 = vmul.f32 %v2387_v55, %v1745_v33  ;;  %v1794_v53 = vadd.f32 %v1965_v36, %v1783_v58 }
 0xc22   : > { %1998 = vst [vmem:[%s389_s12] sm:$0xff] %v1997_v49   ;;  %v1784_v56 = vmul.f32 %v1964_v41, %v1773_v51 }
 0xc24   : > { %v1795_v54 = vadd.f32 %v1965_v36, %v1784_v56 }
 0xc26   : > { %v2002_v59 = vpack.c.bf16 %v1795_v54, %v1794_v53 }
 0xc28   : > { %2006 = vst [vmem:[%s389_s12 + $0x8] sm:$0xff] %v2002_v59  }
 0xc29 PF: > { %s22_s13 = sadd.s32 1, %s2458_s13  }
 0xc2a   : > { %p19_p5 = scmp.ge.s32.totalorder %s22_s13, 4  }
 0xc2c   :  { %21 = sbr.rel (!%p19_p5) target bundleno = 2 (0x2), region = 99 }
 0xc33   :  { %1837 = vsyncpa [#allocation3], 1 }
 0xc34   :  { %1839 = vsyncpa [#allocation3 + $0x1], 1 }
 0xc35   :  { %1840 = vsyncpa [#allocation5], 1 }

// kernel: encoder_forward.3
= control target key start
LH: loop header
LB: loop body
LE: loop exit
PB: predicated region body
PF: predicated region fallthrough
CT: control target
= control target key end

     0   :  { %s2374_s13 = smov 0   ;;  %s2753_s0 = inlined_call_operand.vmem [shape: bf16[2,32,128], index: 0, kind: input, shape index: {}]   ;;  %s2754_s1 = inlined_call_operand.vmem [shape: bf16[32,128], index: 1, kind: input, shape index: {}]   ;;  %s2755_s2 = inlined_call_operand.vmem [shape: bf16[128,128], index: 2, kind: input, shape index: {}]   ;;  %s2756_s3 = inlined_call_operand.vmem [shape: f32[1,128], index: 3, kind: input, shape index: {}]   ;;  %s2757_s4 = inlined_call_operand.vmem [shape: bf16[128,384], index: 4, kind: input, shape index: {}]   ;;  %s2758_s5 = inlined_call_operand.vmem [shape: f32[1,384], index: 5, kind: input, shape index: {}]   ;;  %s2759_s6 = inlined_call_operand.vmem [shape: bf16[128,128], index: 6, kind: input, shape index: {}]   ;;  %s2760_s7 = inlined_call_operand.vmem [shape: f32[1,128], index: 7, kind: input, shape index: {}]   ;;  %s2761_s8 = inlined_call_operand.vmem [shape: f32[1,128], index: 8, kind: input, shape index: {}]   ;;  %s2762_s9 = inlined_call_operand.vmem [shape: f32[1,128], index: 9, kind: input, shape index: {}]   ;;  %s2763_s10 = inlined_call_operand.vmem [shape: bf16[2,32,128], index: 10, kind: output, shape index: {}]  }
   0x1 LB: > { %s1841_s14 = sadd.s32 4294967295, %s2313_s13   ;;  %p1845_p0 = scmp.ge.s32.totalorder %s2313_s13, 1  ;;  %s2313_s13 = sphi %s2374_s13, %s20_s13  }
   0x2   : > { %p312_p1 = scmp.lt.s32.totalorder %s2313_s13, 3 }
   0x4   : > { %p313_p2 = pnand %p1845_p0, %p312_p1 }
   0x5   : > { %v2187_v0 = vld [vmem:[%s2755_s2] sm:$0xff] (!%p313_p2)   ;;  %p350_p3 = scmp.lt.s32.totalorder (!%p313_p2), %s1841_s14, 1  ;;  %v2188_v1 = vld [vmem:[%s2755_s2 + $0x8] sm:$0xff] (!%p313_p2)   ;;  %v2189_v2 = vld [vmem:[%s2755_s2 + $0x10] sm:$0xff] (!%p313_p2)   ;;  %v2315_v50 = vmov (!%p313_p2), 0   ;;  %vm794_vm0 = vcmask (!%p313_p2), 261120  }
   0x6   : > { %316 = sbr.rel (%p313_p2) target bundleno = 3048 (0xbe8), region = 60  ;;  %2013 = vmatprep.subr.bf16.mxu0 (!%p313_p2), %v2187_v0  ;;  %v2190_v3 = vld [vmem:[%s2755_s2 + $0x18] sm:$0xff] (!%p313_p2)   ;;  %v1931_v5 = vld [vmem:[%s2754_s1] sm:$0xff] (!%p313_p2)   ;;  %v2192_v19 = vld [vmem:[%s2755_s2 + $0x28] sm:$0xff] (!%p313_p2)   ;;  %718 = vmatprep.mubr.bf16.mxu1 (!%p313_p2), %v2315_v50  ;;  %s2316_s23 = smov (!%p313_p2), 96   ;;  %vm1559_vm1 = vcmask (!%p313_p2), 523264  }
   0x7   : > { %2014 = vmatpush3.bf16.msra.mxu0 (!%p313_p2), %v2187_v0  ;;  %v1932_v8 = vunpack.c.l.bf16 (!%p313_p2), %v1931_v5  ;;  %v1933_v9 = vunpack.c.h.bf16 (!%p313_p2), %v1931_v5  ;;  %v2195_v10 = vld [vmem:[%s2757_s4 + $0x4] ss:$12 sps:$4 sm:$0xff] (!%p313_p2)   ;;  %v2197_v11 = vld [vmem:[%s2757_s4] ss:$12 sps:$4 sm:$0xff] (!%p313_p2)   ;;  %v2199_v15 = vld [vmem:[%s2757_s4 + $0x1c] ss:$12 sps:$4 sm:$0xff] (!%p313_p2)  }
   0x8   : > { %2015 = vmatprep.subr.bf16.mxu0 (!%p313_p2), %v2188_v1  ;;  %v2191_v14 = vld [vmem:[%s2755_s2 + $0x20] sm:$0xff] (!%p313_p2)   ;;  %686 = vmatprep.subr.bf16.mxu1 (!%p313_p2), %v2195_v10  ;;  %v2205_v20 = vld [vmem:[%s2757_s4 + $0x30] ss:$12 sps:$4 sm:$0xff] (!%p313_p2)   ;;  %v2207_v21 = vld [vmem:[%s2757_s4 + $0x4c] ss:$12 sps:$4 sm:$0xff] (!%p313_p2)   ;;  %s2317_s25 = smov (!%p313_p2), 64  }
   0x9   : > { %687 = vmatpush1.bf16.msra.mxu1 (!%p313_p2), %v2197_v11  ;;  %v2201_v17 = vld [vmem:[%s2757_s4 + $0x18] ss:$12 sps:$4 sm:$0xff] (!%p313_p2)   ;;  %v2203_v18 = vld [vmem:[%s2757_s4 + $0x34] ss:$12 sps:$4 sm:$0xff] (!%p313_p2)   ;;  %v1949_v23 = vld [vmem:[%s2754_s1 + $0x8] sm:$0xff] (!%p313_p2)   ;;  %s2318_s26 = smov (!%p313_p2), 32  }
   0xa   : > { %688 = vmatprep.subr.bf16.mxu1 (!%p313_p2), %v2199_v15  ;;  %v2193_v24 = vld [vmem:[%s2755_s2 + $0x30] sm:$0xff] (!%p313_p2)   ;;  %v2194_v26 = vld [vmem:[%s2755_s2 + $0x38] sm:$0xff] (!%p313_p2)   ;;  %v1936_v29 = vunpack.c.l.bf16 (!%p313_p2), %v1949_v23  ;;  %v1937_v30 = vunpack.c.h.bf16 (!%p313_p2), %v1949_v23  ;;  %v2213_v32 = vld [vmem:[%s2757_s4 + $0x60] ss:$12 sps:$4 sm:$0xff] (!%p313_p2)   ;;  %vm1564_vm2 = vcmask (!%p313_p2), 785408  }
   0xb   : > { %2016 = vmatpush3.bf16.msra.mxu0 (!%p313_p2), %v2188_v1  ;;  %v2209_v25 = vld [vmem:[%s2757_s4 + $0x48] ss:$12 sps:$4 sm:$0xff] (!%p313_p2)   ;;  %v2211_v31 = vld [vmem:[%s2757_s4 + $0x64] ss:$12 sps:$4 sm:$0xff] (!%p313_p2)   ;;  %v2202_v39 = vld [vmem:[%s2757_s4 + $0x20] ss:$12 sps:$4 sm:$0xff] (!%p313_p2)  }
   0xc   : > { %2017 = vmatprep.subr.bf16.mxu0 (!%p313_p2), %v2189_v2  ;;  %v2215_v33 = vld [vmem:[%s2757_s4 + $0x7c] ss:$12 sps:$4 sm:$0xff] (!%p313_p2)   ;;  %v2217_v37 = vld [vmem:[%s2757_s4 + $0x78] ss:$12 sps:$4 sm:$0xff] (!%p313_p2)   ;;  %v2218_v43 = vld [vmem:[%s2757_s4 + $0x80] ss:$12 sps:$4 sm:$0xff] (!%p313_p2)  }
   0xd   : > { %s2765_s14 = smov (!%p350_p3, %s1841_s14), 1  ;;  %689 = vmatpush1.bf16.msra.mxu1 %v2201_v17  ;;  %v2198_v36 = vld [vmem:[%s2757_s4 + $0x8] ss:$12 sps:$4 sm:$0xff]   ;;  %v2206_v40 = vld [vmem:[%s2757_s4 + $0x38] ss:$12 sps:$4 sm:$0xff]  }
   0xe   : > { %s1916_s21 = sshll.u32 %s2765_s14, 4  ;;  %690 = vmatprep.subr.bf16.mxu1 %v2203_v18  ;;  %v2210_v41 = vld [vmem:[%s2757_s4 + $0x50] ss:$12 sps:$4 sm:$0xff]   ;;  %v2214_v42 = vld [vmem:[%s2757_s4 + $0x68] ss:$12 sps:$4 sm:$0xff]  }
   0xf   : > { %s2399_s24 = scalar_lea.vmem %s2753_s0, %s1916_s21  ;;  %2018 = vmatpush3.bf16.msra.mxu0 %v2189_v2  ;;  %v2219_v44 = vld [vmem:[%s2757_s4 + $0x94] ss:$12 sps:$4 sm:$0xff]   ;;  %v2221_v45 = vld [vmem:[%s2757_s4 + $0x90] ss:$12 sps:$4 sm:$0xff]   ;;  %v2222_v46 = vld [vmem:[%s2757_s4 + $0x98] ss:$12 sps:$4 sm:$0xff]   ;;  %v543_v2 = vlaneseq  ;;  %s359_s16 = scalar_lea.vmem %s2763_s10, %s1916_s21 }
  0x10   : > { %v2405_v4 = vld [vmem:[%s2399_s24] sm:$0xff]   ;;  %2019 = vmatprep.subr.bf16.mxu0 %v2190_v3  ;;  %v2444_v22 = vld [vmem:[%s2399_s24 + $0x8] sm:$0xff]   ;;  %v2226_v49 = vld [vmem:[%s2757_s4 + $0xb0] ss:$12 sps:$4 sm:$0xff]  }
  0x11   : > { %v1924_v6 = vunpack.c.l.bf16 %v2405_v4  ;;  %v1925_v7 = vunpack.c.h.bf16 %v2405_v4  ;;  %691 = vmatpush1.bf16.msra.mxu1 %v2205_v20  ;;  %v1928_v27 = vunpack.c.l.bf16 %v2444_v22  ;;  %v1929_v28 = vunpack.c.h.bf16 %v2444_v22  ;;  %v2223_v47 = vld [vmem:[%s2757_s4 + $0xac] ss:$12 sps:$4 sm:$0xff]   ;;  %v2225_v48 = vld [vmem:[%s2757_s4 + $0xa8] ss:$12 sps:$4 sm:$0xff]   ;;  %v1850_v51 = vld [vmem:[%s2756_s3] ss:$0 sm:$0xff] }
  0x12   : > { %692 = vmatprep.subr.bf16.mxu1 %v2207_v21 }
  0x13   : > { %v377_v12 = vadd.f32 %v1932_v8, %v1924_v6  ;;  %v378_v13 = vadd.f32 %v1933_v9, %v1925_v7  ;;  %2020 = vmatpush3.bf16.msra.mxu0 %v2190_v3  ;;  %v379_v34 = vadd.f32 %v1936_v29, %v1928_v27  ;;  %v380_v35 = vadd.f32 %v1937_v30, %v1929_v28  ;;  %v541_v8 = vld [vmem:[%s2758_s5] sm:$0x7] }
  0x14   : > { %2021 = vmatprep.subr.bf16.mxu0 %v2191_v14  ;;  %v544_v3 = vshrl.u32 %v543_v2, 7 }
  0x15   : > { %v381_v16 = vpack.c.bf16 %v378_v13, %v377_v12  ;;  %693 = vmatpush1.bf16.msra.mxu1 %v2209_v25  ;;  %v382_v38 = vpack.c.bf16 %v380_v35, %v379_v34 }
  0x16   : > { %694 = vmatprep.subr.bf16.mxu1 %v2211_v31  ;;  %v545_v5 = vsub.s32 0, %v544_v3  ;;  %v549_v9 = vsub.s32 1, %v544_v3  ;;  %v553_v10 = vsub.s32 2, %v544_v3 }
  0x17   : > { %2029 = vmatprep.mubr.bf16.mxu0 %v381_v16  ;;  %2022 = vmatpush3.bf16.msra.mxu0 %v2191_v14 }
  0x18   : > { %2023 = vmatprep.subr.bf16.mxu0 %v2192_v19  ;;  %v546_v11 = vrot.slane %v541_v8, %v545_v5  ;;  %v550_v13 = vrot.slane %v541_v8, %v549_v9  ;;  %v554_v14 = vrot.slane %v541_v8, %v553_v10 }
  0x19   : > { %695 = vmatpush1.bf16.msra.mxu1 %v2213_v32 }
  0x1a   : > { %696 = vmatprep.subr.bf16.mxu1 %v2215_v33 }
  0x1b   : > { %2024 = vmatpush3.bf16.msra.mxu0 %v2192_v19 }
  0x1c   : > { %2025 = vmatprep.subr.bf16.mxu0 %v2193_v24 }
  0x1d   : > { %697 = vmatpush1.bf16.msra.mxu1 %v2217_v37 }
  0x1e   : > { %698 = vmatprep.subr.bf16.mxu1 %v2219_v44 }
  0x1f   : > { %2026 = vmatpush3.bf16.msra.mxu0 %v2193_v24 }
  0x20   : > { %2027 = vmatprep.subr.bf16.mxu0 %v2194_v26 }
  0x21   : > { %699 = vmatpush1.bf16.msra.mxu1 %v2221_v45 }
  0x22   : > { %700 = vmatprep.subr.bf16.mxu1 %v2223_v47 }
  0x23   : > { %2028 = vmatpush3.bf16.msra.mxu0 %v2194_v26 }
  0x24   : > { %2033 = vmatprep.subr.bf16.mxu0 %v2198_v36 }
  0x25   : > { %701 = vmatpush1.bf16.msra.mxu1 %v2225_v48 }
  0x26   : > { %2030 = vmatmul.mubr.bf16.vlgmr.msra.gmra.mrb[0].mxu0 %v382_v38 }
  0x27   : > { %2034 = vmatpush3.bf16.msra.mxu0 %v2198_v36 }
  0x28   : > { %2035 = vmatprep.subr.bf16.mxu0 %v2202_v39 }
  0x2b   : > { %2036 = vmatpush3.bf16.msra.mxu0 %v2202_v39 }
  0x2c   : > { %2037 = vmatprep.subr.bf16.mxu0 %v2206_v40 }
  0x2f   : > { %2038 = vmatpush3.bf16.msra.mxu0 %v2206_v40 }
  0x30   : > { %2039 = vmatprep.subr.bf16.mxu0 %v2210_v41 }
  0x33   : > { %2040 = vmatpush3.bf16.msra.mxu0 %v2210_v41 }
  0x34   : > { %2041 = vmatprep.subr.bf16.mxu0 %v2214_v42 }
  0x37   : > { %2042 = vmatpush3.bf16.msra.mxu0 %v2214_v42 }
  0x38   : > { %2043 = vmatprep.subr.bf16.mxu0 %v2218_v43 }
  0x3b   : > { %2044 = vmatpush3.bf16.msra.mxu0 %v2218_v43 }
  0x3c   : > { %2045 = vmatprep.subr.bf16.mxu0 %v2222_v46 }
  0x3f   : > { %2046 = vmatpush3.bf16.msra.mxu0 %v2222_v46 }
  0x40   : > { %2047 = vmatprep.subr.bf16.mxu0 %v2226_v49 }
  0x43   : > { %2048 = vmatpush3.bf16.msra.mxu0 %v2226_v49 }
  0xf9   : > { %v2031_v52 = vpop.f32.mrb[0].mxu0 }
  0xfa   : > { %v497_v53 = vadd.f32 %v2031_v52, %v1850_v51  ;;  %v488_v54 = vpop.f32.mrb[1].mxu0 }
  0xfb   : > { %v489_v55 = vadd.f32 %v1850_v51, %v488_v54  ;;  %v2032_v56 = vpop.f32.mrb[2].mxu0 }
  0xfc   : > { %v500_v57 = vadd.f32 %v2032_v56, %v1850_v51  ;;  %v491_v58 = vpop.f32.mrb[3].mxu0  ;;  %v505_v60 = vmax.f32 %v497_v53, 0.0 }
  0xfd   : > { %v492_v59 = vadd.f32 %v1850_v51, %v491_v58  ;;  %v503_v62 = vmax.f32 %v489_v55, 0.0 }
  0xfe   : > { %v506_v61 = vmax.f32 %v500_v57, 0.0 }
  0xff   : > { %v504_v63 = vmax.f32 %v492_v59, 0.0 }
 0x100   : > { %v508_v0 = vpack.c.bf16 %v506_v61, %v505_v60 }
 0x101   : > { %v507_v1 = vpack.c.bf16 %v504_v63, %v503_v62 }
 0x103   : > { %719 = vmatmul.mubr.bf16.vlgmr.msra.gmra.mrb[0].mxu1 %v507_v1  ;;  %2049 = vmatprep.mubr.bf16.mxu0 %v507_v1 }
 0x104   : > { %2050 = vmatmul.mubr.bf16.vlgmr.msra.gmra.mrb[4].mxu0 %v508_v0  ;;  %728 = vmatprep.mubr.bf16.mxu1 %v2315_v50 }
 0x10b   : > { %729 = vmatmul.mubr.bf16.gmra.mrb[4].mxu1 %v508_v0 }
 0x1d6   : > { %v720_v12 = vpop.f32.mrb[0].mxu1 }
 0x1d7   : > { %v722_v15 = vpop.f32.mrb[1].mxu1  ;;  %v2051_v16 = vpop.f32.mrb[4].mxu0  ;;  %v721_v19 = vadd.f32 %v720_v12, %v546_v11 }
 0x1d8   : > { %v724_v17 = vpop.f32.mrb[2].mxu1  ;;  %v773_v18 = vpop.f32.mrb[5].mxu0  ;;  %v723_v24 = vadd.f32 %v722_v15, %v550_v13  ;;  %v782_v25 = vadd.f32 %v2051_v16, %v554_v14 }
 0x1d9   : > { %v725_v20 = vadd.f32 %v724_v17, %v546_v11  ;;  %v726_v21 = vpop.f32.mrb[3].mxu1  ;;  %v2052_v23 = vpop.f32.mrb[6].mxu0  ;;  %v774_v32 = vadd.f32 %v773_v18, %v554_v14 }
 0x1da   : > { %v727_v26 = vadd.f32 %v726_v21, %v550_v13  ;;  %v785_v29 = vadd.f32 %v2052_v23, %v554_v14  ;;  %v776_v30 = vpop.f32.mrb[7].mxu0 }
 0x1db   : > { %v2518_v31 = vpack.c.bf16 %v725_v20, %v721_v19  ;;  %v777_v33 = vadd.f32 %v776_v30, %v554_v14 }
 0x1dc   : > { %v2520_v34 = vpack.c.bf16 %v727_v26, %v723_v24  ;;  %v2522_v35 = vpack.c.bf16 %v785_v29, %v782_v25 }
 0x1dd   : > { %v2524_v36 = vpack.c.bf16 %v777_v33, %v774_v32  ;;  %2057 = vmatprep.mubr.msk.bf16.mxu1 %vm794_vm0, %v2518_v31 }
 0x1de   : > { %v730_v37 = vpop.f32.mrb[4].mxu1  ;;  %2137 = vmatprep.subr.msk.bf16.mxu1 %vm794_vm0, %v2520_v34  ;;  %v802_v38 = vsel %vm794_vm0, %v2520_v34, 0 }
 0x1df   : > { %v732_v39 = vpop.f32.mrb[5].mxu1  ;;  %2054 = vmatpush3.bf16.xpose.msra.mxu1 %v802_v38  ;;  %v731_v41 = vadd.f32 %v730_v37, %v546_v11 }
 0x1e0   : > { %v734_v40 = vpop.f32.mrb[6].mxu1  ;;  %v733_v44 = vadd.f32 %v732_v39, %v550_v13 }
 0x1e1   : > { %v735_v42 = vadd.f32 %v734_v40, %v546_v11  ;;  %v736_v43 = vpop.f32.mrb[7].mxu1 }
 0x1e2   : > { %v737_v45 = vadd.f32 %v736_v43, %v550_v13 }
 0x1e3   : > { %v2532_v46 = vpack.c.bf16 %v735_v42, %v731_v41 }
 0x1e4   : > { %v2534_v47 = vpack.c.bf16 %v737_v45, %v733_v44 }
 0x1e6   : > { %2138 = vmatprep.subr.msk.bf16.mxu1 %vm794_vm0, %v2534_v47  ;;  %v805_v48 = vsel %vm794_vm0, %v2534_v47, 0 }
 0x1e7   : > { %2056 = vmatpush3.bf16.xpose.msra.mxu1 %v805_v48 }
 0x1e8   : > { %2061 = vmatprep.subr.bf16.mxu1 %v2524_v36 }
 0x1ee   : > { %2058 = vmatmul.mubr.msk.bf16.vlgmr.msra.gmra.mrb[8].mxu1 %vm794_vm0, %v2532_v46 }
 0x1ef   : > { %2062 = vmatpush3.bf16.msra.mxu1 %v2524_v36 }
 0x1f0   : > { %2063 = vmatprep.subr.bf16.mxu1 %v2522_v35 }
 0x1f3   : > { %2064 = vmatpush3.bf16.msra.mxu1 %v2522_v35 }
 0x2c1   : > { %v2059_v49 = vpop.f32.mrb[8].mxu1 }
 0x2c2   : > { %v858_v50 = vmul.f32 0.17677669, %v2059_v49  ;;  %v841_v51 = vpop.f32.mrb[9].mxu1 }
 0x2c3   : > { %v856_v52 = vmul.f32 0.17677669, %v841_v51  ;;  %v2060_v53 = vpop.f32.mrb[10].mxu1 }
 0x2c4   : > { %v859_v54 = vmul.f32 0.17677669, %v2060_v53  ;;  %v844_v55 = vpop.f32.mrb[11].mxu1  ;;  %v866_v56 = vsel %vm794_vm0, %v858_v50, -inf }
 0x2c5   : > { %v857_v57 = vmul.f32 0.17677669, %v844_v55  ;;  %867 = vmax.xlane.f32.xlu1 %v866_v56  ;;  %v860_v58 = vsel %vm794_vm0, %v856_v52, -inf }
 0x2c6   : > { %861 = vmax.xlane.f32.xlu0 %v860_v58  ;;  %v869_v59 = vsel %vm794_vm0, %v859_v54, -inf }
 0x2c7   : > { %v863_v60 = vsel %vm794_vm0, %v857_v57, -inf }
 0x2c9   : > { %870 = vmax.xlane.f32.xlu1 %v869_v59 }
 0x2ca   : > { %864 = vmax.xlane.f32.xlu0 %v863_v60 }
 0x352   : > { %v868_v61 = vpop.xlane.xlu1 %867 }
 0x353   : > { %v874_v62 = vsub.f32 %v858_v50, %v868_v61  ;;  %v862_v63 = vpop.xlane.xlu0 %861 }
 0x354   : > { %v872_v0 = vsub.f32 %v856_v52, %v862_v63 }
 0x355   : > { %v880_v1 = vmul.f32 1.442695, %v874_v62 }
 0x356   : > { %v876_v2 = vmul.f32 1.442695, %v872_v0  ;;  %v871_v3 = vpop.xlane.xlu1 %870 }
 0x357   : > { %2235 = vpow2.f32 %v880_v1  ;;  %v875_v5 = vsub.f32 %v859_v54, %v871_v3  ;;  %v865_v8 = vpop.xlane.xlu0 %864 }
 0x358   : > { %v873_v9 = vsub.f32 %v857_v57, %v865_v8  ;;  %2237 = vpow2.f32 %v876_v2 }
 0x359   : > { %v882_v10 = vmul.f32 1.442695, %v875_v5 }
 0x35a   : > { %v878_v11 = vmul.f32 1.442695, %v873_v9 }
 0x35c   : > { %2239 = vpow2.f32 %v878_v11 }
 0x35d   : > { %2241 = vpow2.f32 %v882_v10 }
 0x361   : > { %v2236_v12 = vpop.eup %2235 }
 0x362   : > { %v890_v13 = vsel %vm794_vm0, %v2236_v12, 0.0  ;;  %v2238_v14 = vpop.eup %2237 }
 0x363   : > { %891 = vadd.xlane.f32.xlu0 %v890_v13  ;;  %v884_v16 = vsel %vm794_vm0, %v2238_v14, 0.0 }
 0x366   : > { %v2240_v15 = vpop.eup %2239 }
 0x367   : > { %885 = vadd.xlane.f32.xlu0 %v884_v16  ;;  %v887_v17 = vsel %vm794_vm0, %v2240_v15, 0.0  ;;  %v2242_v18 = vpop.eup %2241 }
 0x368   : > { %888 = vadd.xlane.f32.xlu1 %v887_v17  ;;  %v893_v19 = vsel %vm794_vm0, %v2242_v18, 0.0 }
 0x36c   : > { %894 = vadd.xlane.f32.xlu1 %v893_v19 }
 0x37d   : > { %969 = vrot.lane.b32.xlu0 %v2520_v34, %s2316_s23  ;;  %971 = vrot.lane.b32.xlu1 %v2534_v47, %s2316_s23 }
 0x381   : > { %965 = vrot.lane.b32.xlu0 %v2532_v46, %s2316_s23  ;;  %963 = vrot.lane.b32.xlu1 %v2518_v31, %s2316_s23 }
 0x385   : > { %1147 = vrot.lane.b32.xlu0 %v2518_v31, %s2317_s25  ;;  %1151 = vrot.lane.b32.xlu1 %v2520_v34, %s2317_s25 }
 0x389   : > { %1153 = vrot.lane.b32.xlu1 %v2534_v47, %s2317_s25 }
 0x38d   : > { %1149 = vrot.lane.b32.xlu1 %v2532_v46, %s2317_s25 }
 0x3f0   : > { %v892_v20 = vpop.xlane.xlu0 %891 }
 0x3f4   : > { %v886_v21 = vpop.xlane.xlu0 %885 }
 0x3f5   : > { %2243 = vrcp.f32 %v886_v21  ;;  %v889_v23 = vpop.xlane.xlu1 %888 }
 0x3f6   : > { %2245 = vrcp.f32 %v889_v23 }
 0x3f7   : > { %2247 = vrcp.f32 %v892_v20 }
 0x3f8   : > { %v970_v24 = vpop.permute.xlu0 %969 }
 0x3f9   : > { %v895_v25 = vpop.xlane.xlu1 %894  ;;  %2139 = vmatprep.subr.msk.bf16.mxu1 %vm794_vm0, %v970_v24  ;;  %v980_v43 = vsel %vm794_vm0, %v970_v24, 0 }
 0x3fa   : > { %2249 = vrcp.f32 %v895_v25 }
 0x3fc   : > { %v966_v49 = vpop.permute.xlu0 %965 }
 0x3fd   : > { %v972_v37 = vpop.permute.xlu1 %971 }
 0x3fe   : > { %v983_v45 = vsel %vm794_vm0, %v972_v37, 0 }
 0x3ff   : > { %v2244_v26 = vpop.eup %2243 }
 0x400   : > { %v2246_v29 = vpop.eup %2245  ;;  %v900_v30 = vmul.f32 %v2244_v26, %v2238_v14  ;;  %v1148_v50 = vpop.permute.xlu0 %1147 }
 0x401   : > { %v901_v32 = vmul.f32 %v2246_v29, %v2240_v15  ;;  %v2248_v33 = vpop.eup %2247  ;;  %v964_v44 = vpop.permute.xlu1 %963 }
 0x402   : > { %v902_v40 = vmul.f32 %v2248_v33, %v2236_v12 }
 0x403   : > { %v904_v38 = vpack.c.bf16 %v901_v32, %v900_v30 }
 0x404   : > { %v2250_v39 = vpop.eup %2249 }
 0x405   : > { %v903_v41 = vmul.f32 %v2250_v39, %v2242_v18  ;;  %2065 = vmatprep.mubr.msk.bf16.mxu1 %vm794_vm0, %v904_v38  ;;  %v1152_v48 = vpop.permute.xlu1 %1151 }
 0x406   : > { %v1162_v51 = vsel %vm794_vm0, %v1152_v48, 0 }
 0x407   : > { %v905_v42 = vpack.c.bf16 %v903_v41, %v902_v40 }
 0x409   : > { %2066 = vmatmul.mubr.msk.bf16.vlgmr.msra.gmra.mrb[12].mxu1 %vm794_vm0, %v905_v42  ;;  %v1154_v52 = vpop.permute.xlu1 %1153 }
 0x40a   : > { %2070 = vmatpush3.bf16.xpose.msra.mxu1 %v980_v43  ;;  %2073 = vmatprep.mubr.msk.bf16.mxu1 %vm794_vm0, %v964_v44  ;;  %v1165_v53 = vsel %vm794_vm0, %v1154_v52, 0 }
 0x40b   : > { %2140 = vmatprep.subr.msk.bf16.mxu1 %vm794_vm0, %v972_v37 }
 0x40d   : > { %v1150_v54 = vpop.permute.xlu1 %1149 }
 0x412   : > { %2072 = vmatpush3.bf16.xpose.msra.mxu1 %v983_v45 }
 0x413   : > { %2141 = vmatprep.subr.msk.bf16.mxu1 %vm794_vm0, %v1152_v48 }
 0x419   : > { %2074 = vmatmul.mubr.msk.bf16.vlgmr.msra.gmra.mrb[16].mxu1 %vm794_vm0, %v966_v49 }
 0x41a   : > { %2086 = vmatpush3.bf16.xpose.msra.mxu1 %v1162_v51  ;;  %2089 = vmatprep.mubr.msk.bf16.mxu1 %vm794_vm0, %v1148_v50 }
 0x41b   : > { %2142 = vmatprep.subr.msk.bf16.mxu1 %vm794_vm0, %v1154_v52 }
 0x422   : > { %2088 = vmatpush3.bf16.xpose.msra.mxu1 %v1165_v53 }
 0x429   : > { %2090 = vmatmul.mubr.msk.bf16.vlgmr.msra.gmra.mrb[20].mxu1 %vm794_vm0, %v1150_v54 }
 0x4dc   : > { %v2584_v55 = vpop.f32.mrb[12].mxu1 }
 0x4dd   : > { %v2586_v56 = vpop.f32.mrb[13].mxu1 }
 0x4de   : > { %v2588_v57 = vpop.f32.mrb[14].mxu1 }
 0x4df   : > { %v2590_v58 = vpop.f32.mrb[15].mxu1 }
 0x4ec   : > { %v2075_v59 = vpop.f32.mrb[16].mxu1 }
 0x4ed   : > { %v1019_v60 = vpop.f32.mrb[17].mxu1  ;;  %v2612_v42 = vmul.f32 0.17677669, %v2075_v59 }
 0x4ee   : > { %v2076_v61 = vpop.f32.mrb[18].mxu1  ;;  %v1034_v41 = vmul.f32 0.17677669, %v1019_v60 }
 0x4ef   : > { %v1022_v62 = vpop.f32.mrb[19].mxu1  ;;  %v2615_v44 = vmul.f32 0.17677669, %v2076_v61  ;;  %v1044_v45 = vsel %vm794_vm0, %v2612_v42, -inf }
 0x4f0   : > { %v1038_v43 = vsel %vm794_vm0, %v1034_v41, -inf }
 0x4fc   : > { %v2091_v63 = vpop.f32.mrb[20].mxu1 }
 0x4fd   : > { %v1201_v0 = vpop.f32.mrb[21].mxu1  ;;  %v1218_v5 = vmul.f32 0.17677669, %v2091_v63 }
 0x4fe   : > { %v1216_v1 = vmul.f32 0.17677669, %v1201_v0  ;;  %v2092_v2 = vpop.f32.mrb[22].mxu1 }
 0x4ff   : > { %v1204_v3 = vpop.f32.mrb[23].mxu1  ;;  %v1219_v11 = vmul.f32 0.17677669, %v2092_v2  ;;  %v1226_v12 = vsel %vm794_vm0, %v1218_v5, -inf }
 0x500   : > { %v1217_v8 = vmul.f32 0.17677669, %v1204_v3  ;;  %v1220_v9 = vsel %vm794_vm0, %v1216_v1, -inf }
 0x501   : > { %1221 = vmax.xlane.f32.xlu0 %v1220_v9  ;;  %v1229_v13 = vsel %vm794_vm0, %v1219_v11, -inf }
 0x502   : > { %v1223_v10 = vsel %vm794_vm0, %v1217_v8, -inf }
 0x503   : > { %1224 = vmax.xlane.f32.xlu1 %v1223_v10 }
 0x505   : > { %1227 = vmax.xlane.f32.xlu0 %v1226_v12 }
 0x509   : > { %1230 = vmax.xlane.f32.xlu0 %v1229_v13 }
 0x514   : > { %1268 = vrot.lane.b32.xlu1 %v2522_v35, %s2317_s25 }
 0x58e   : > { %v1222_v14 = vpop.xlane.xlu0 %1221 }
 0x58f   : > { %v1232_v15 = vsub.f32 %v1216_v1, %v1222_v14 }
 0x590   : > { %v1225_v16 = vpop.xlane.xlu1 %1224 }
 0x591   : > { %v1236_v19 = vmul.f32 1.442695, %v1232_v15  ;;  %v1233_v20 = vsub.f32 %v1217_v8, %v1225_v16 }
 0x592   : > { %v1228_v17 = vpop.xlane.xlu0 %1227 }
 0x593   : > { %v1234_v18 = vsub.f32 %v1218_v5, %v1228_v17  ;;  %v1238_v25 = vmul.f32 1.442695, %v1233_v20 }
 0x595   : > { %v1240_v21 = vmul.f32 1.442695, %v1234_v18 }
 0x596   : > { %v1231_v23 = vpop.xlane.xlu0 %1230 }
 0x597   : > { %2251 = vpow2.f32 %v1240_v21  ;;  %v1235_v24 = vsub.f32 %v1219_v11, %v1231_v23 }
 0x598   : > { %2253 = vpow2.f32 %v1236_v19 }
 0x599   : > { %v1242_v26 = vmul.f32 1.442695, %v1235_v24 }
 0x59b   : > { %2255 = vpow2.f32 %v1242_v26 }
 0x59c   : > { %2257 = vpow2.f32 %v1238_v25 }
 0x5a1   : > { %v2252_v29 = vpop.eup %2251 }
 0x5a2   : > { %v1250_v30 = vsel %vm794_vm0, %v2252_v29, 0.0  ;;  %v2254_v32 = vpop.eup %2253 }
 0x5a3   : > { %1251 = vadd.xlane.f32.xlu0 %v1250_v30  ;;  %v1244_v37 = vsel %vm794_vm0, %v2254_v32, 0.0 }
 0x5a5   : > { %v2256_v33 = vpop.eup %2255 }
 0x5a6   : > { %v1253_v38 = vsel %vm794_vm0, %v2256_v33, 0.0  ;;  %v2258_v39 = vpop.eup %2257 }
 0x5a7   : > { %1245 = vadd.xlane.f32.xlu0 %v1244_v37  ;;  %1254 = vadd.xlane.f32.xlu1 %v1253_v38  ;;  %v1247_v40 = vsel %vm794_vm0, %v2258_v39, 0.0 }
 0x5ab   : > { %1248 = vadd.xlane.f32.xlu1 %v1247_v40 }
 0x5bc   : > { %1331 = vrot.lane.b32.xlu1 %v2520_v34, %s2318_s26  ;;  %v1035_v34 = vmul.f32 0.17677669, %v1022_v62 }
 0x5bd   : > { %1266 = vrot.lane.b32.xlu0 %v2524_v36, %s2317_s25 }
 0x5c0   : > { %1333 = vrot.lane.b32.xlu1 %v2534_v47, %s2318_s26  ;;  %v1047_v47 = vsel %vm794_vm0, %v2615_v44, -inf }
 0x5c1   : > { %1327 = vrot.lane.b32.xlu0 %v2518_v31, %s2318_s26  ;;  %v1041_v31 = vsel %vm794_vm0, %v1035_v34, -inf }
 0x5c4   : > { %1329 = vrot.lane.b32.xlu1 %v2532_v46, %s2318_s26  ;;  %v1269_v46 = vpop.permute.xlu1 %1268 }
 0x5e0   : > { %1039 = vmax.xlane.f32.xlu0 %v1038_v43 }
 0x5e4   : > { %1045 = vmax.xlane.f32.xlu0 %v1044_v45 }
 0x5e8   : > { %1048 = vmax.xlane.f32.xlu0 %v1047_v47  ;;  %1042 = vmax.xlane.f32.xlu1 %v1041_v31 }
 0x630   : > { %v1252_v48 = vpop.xlane.xlu0 %1251 }
 0x634   : > { %v1246_v49 = vpop.xlane.xlu0 %1245  ;;  %v1255_v50 = vpop.xlane.xlu1 %1254 }
 0x635   : > { %2259 = vrcp.f32 %v1255_v50 }
 0x636   : > { %2261 = vrcp.f32 %v1246_v49 }
 0x637   : > { %2263 = vrcp.f32 %v1252_v48 }
 0x638   : > { %v1267_v51 = vpop.permute.xlu0 %1266  ;;  %v1249_v52 = vpop.xlane.xlu1 %1248 }
 0x639   : > { %2265 = vrcp.f32 %v1249_v52  ;;  %2093 = vmatprep.subr.bf16.mxu1 %v1267_v51 }
 0x63a   : > { %2094 = vmatpush3.bf16.msra.mxu1 %v1267_v51 }
 0x63b   : > { %2095 = vmatprep.subr.bf16.mxu1 %v1269_v46 }
 0x63c   : > { %v1332_v53 = vpop.permute.xlu1 %1331  ;;  %v1328_v5 = vpop.permute.xlu0 %1327 }
 0x63d   : > { %v1342_v8 = vsel %vm794_vm0, %v1332_v53, 0 }
 0x63e   : > { %2096 = vmatpush3.bf16.msra.mxu1 %v1269_v46 }
 0x63f   : > { %2143 = vmatprep.subr.msk.bf16.mxu1 %vm794_vm0, %v1332_v53  ;;  %v2260_v54 = vpop.eup %2259 }
 0x640   : > { %v2262_v59 = vpop.eup %2261  ;;  %v1263_v62 = vmul.f32 %v2260_v54, %v2256_v33  ;;  %v1334_v9 = vpop.permute.xlu1 %1333 }
 0x641   : > { %v2264_v60 = vpop.eup %2263  ;;  %v1260_v63 = vmul.f32 %v2262_v59, %v2254_v32  ;;  %v1345_v10 = vsel %vm794_vm0, %v1334_v9, 0 }
 0x642   : > { %v1262_v1 = vmul.f32 %v2264_v60, %v2252_v29 }
 0x643   : > { %v2266_v61 = vpop.eup %2265 }
 0x644   : > { %v1261_v0 = vmul.f32 %v2266_v61, %v2258_v39  ;;  %v1265_v3 = vpack.c.bf16 %v1263_v62, %v1262_v1  ;;  %v1330_v11 = vpop.permute.xlu1 %1329 }
 0x646   : > { %v1264_v2 = vpack.c.bf16 %v1261_v0, %v1260_v63 }
 0x648   : > { %2097 = vmatprep.mubr.msk.bf16.mxu1 %vm794_vm0, %v1264_v2 }
 0x649   : > { %2098 = vmatmul.mubr.msk.bf16.vlgmr.msra.gmra.mrb[24].mxu1 %vm794_vm0, %v1265_v3 }
 0x64a   : > { %2102 = vmatpush3.bf16.xpose.msra.mxu1 %v1342_v8  ;;  %2105 = vmatprep.mubr.msk.bf16.mxu1 %vm794_vm0, %v1328_v5 }
 0x64b   : > { %2144 = vmatprep.subr.msk.bf16.mxu1 %vm794_vm0, %v1334_v9 }
 0x652   : > { %2104 = vmatpush3.bf16.xpose.msra.mxu1 %v1345_v10 }
 0x659   : > { %2106 = vmatmul.mubr.msk.bf16.vlgmr.msra.gmra.mrb[28].mxu1 %vm794_vm0, %v1330_v11 }
 0x66d   : > { %v1040_v12 = vpop.xlane.xlu0 %1039 }
 0x66e   : > { %v1050_v21 = vsub.f32 %v1034_v41, %v1040_v12 }
 0x670   : > { %v1054_v25 = vmul.f32 1.442695, %v1050_v21 }
 0x671   : > { %v1046_v18 = vpop.xlane.xlu0 %1045 }
 0x672   : > { %v1052_v26 = vsub.f32 %v2612_v42, %v1046_v18  ;;  %2267 = vpow2.f32 %v1054_v25 }
 0x674   : > { %v1058_v32 = vmul.f32 1.442695, %v1052_v26 }
 0x675   : > { %v1043_v20 = vpop.xlane.xlu1 %1042  ;;  %v1049_v24 = vpop.xlane.xlu0 %1048 }
 0x676   : > { %v1051_v23 = vsub.f32 %v1035_v34, %v1043_v20  ;;  %v1053_v29 = vsub.f32 %v2615_v44, %v1049_v24 }
 0x678   : > { %v1056_v30 = vmul.f32 1.442695, %v1051_v23  ;;  %v1060_v37 = vmul.f32 1.442695, %v1053_v29 }
 0x67a   : > { %2269 = vpow2.f32 %v1056_v30 }
 0x67b   : > { %2271 = vpow2.f32 %v1058_v32 }
 0x67c   : > { %2273 = vpow2.f32 %v1060_v37  ;;  %v2268_v31 = vpop.eup %2267 }
 0x67d   : > { %v1062_v49 = vsel %vm794_vm0, %v2268_v31, 0.0 }
 0x684   : > { %v2270_v48 = vpop.eup %2269 }
 0x685   : > { %v2649_v50 = vpop.eup %2271  ;;  %v1065_v51 = vsel %vm794_vm0, %v2270_v48, 0.0 }
 0x686   : > { %v2652_v52 = vpop.eup %2273  ;;  %v1068_v53 = vsel %vm794_vm0, %v2649_v50, 0.0 }
 0x687   : > { %v1071_v54 = vsel %vm794_vm0, %v2652_v52, 0.0 }
 0x71c   : > { %v2630_v13 = vpop.f32.mrb[24].mxu1 }
 0x71d   : > { %v2632_v14 = vpop.f32.mrb[25].mxu1 }
 0x71e   : > { %v2634_v15 = vpop.f32.mrb[26].mxu1 }
 0x71f   : > { %v2172_v16 = vpack.i.bf16 %v2634_v15, %v2630_v13  ;;  %v2638_v17 = vpop.f32.mrb[27].mxu1 }
 0x720   : > { %v2167_v19 = vpack.i.bf16 %v2638_v17, %v2632_v14 }
 0x72c   : > { %v2107_v33 = vpop.f32.mrb[28].mxu1 }
 0x72d   : > { %v1381_v38 = vpop.f32.mrb[29].mxu1  ;;  %v1398_v45 = vmul.f32 0.17677669, %v2107_v33 }
 0x72e   : > { %v1396_v39 = vmul.f32 0.17677669, %v1381_v38  ;;  %v2108_v40 = vpop.f32.mrb[30].mxu1 }
 0x72f   : > { %v1384_v43 = vpop.f32.mrb[31].mxu1  ;;  %v1399_v42 = vmul.f32 0.17677669, %v2108_v40  ;;  %v1406_v47 = vsel %vm794_vm0, %v1398_v45, -inf }
 0x730   : > { %v1397_v41 = vmul.f32 0.17677669, %v1384_v43  ;;  %v1400_v34 = vsel %vm794_vm0, %v1396_v39, -inf }
 0x731   : > { %1401 = vmax.xlane.f32.xlu0 %v1400_v34  ;;  %v1409_v46 = vsel %vm794_vm0, %v1399_v42, -inf }
 0x732   : > { %v1403_v44 = vsel %vm794_vm0, %v1397_v41, -inf }
 0x733   : > { %1404 = vmax.xlane.f32.xlu1 %v1403_v44 }
 0x735   : > { %1407 = vmax.xlane.f32.xlu0 %v1406_v47 }
 0x737   : > { %1410 = vmax.xlane.f32.xlu1 %v1409_v46 }
 0x739   : > { %1063 = vadd.xlane.f32.xlu0 %v1062_v49 }
 0x73b   : > { %1066 = vadd.xlane.f32.xlu1 %v1065_v51 }
 0x73d   : > { %1069 = vadd.xlane.f32.xlu0 %v1068_v53 }
 0x73f   : > { %1072 = vadd.xlane.f32.xlu1 %v1071_v54 }
 0x750   : > { %1088 = vrot.lane.b32.xlu1 %v2522_v35, %s2316_s23 }
 0x754   : > { %1446 = vrot.lane.b32.xlu1 %v2524_v36, %s2318_s26 }
 0x7be   : > { %v1402_v59 = vpop.xlane.xlu0 %1401 }
 0x7bf   : > { %v1412_v60 = vsub.f32 %v1396_v39, %v1402_v59 }
 0x7c0   : > { %v1405_v61 = vpop.xlane.xlu1 %1404 }
 0x7c1   : > { %v1416_v62 = vmul.f32 1.442695, %v1412_v60  ;;  %v1413_v0 = vsub.f32 %v1397_v41, %v1405_v61 }
 0x7c2   : > { %v1408_v63 = vpop.xlane.xlu0 %1407 }
 0x7c3   : > { %v1414_v1 = vsub.f32 %v1398_v45, %v1408_v63  ;;  %2275 = vpow2.f32 %v1416_v62  ;;  %v1418_v9 = vmul.f32 1.442695, %v1413_v0  ;;  %v2227_v63 = vld [vmem:[%s2759_s6] sm:$0xff]   ;;  %v2228_v0 = vld [vmem:[%s2759_s6 + $0x8] sm:$0xff]  }
 0x7c4   : > { %v1411_v2 = vpop.xlane.xlu1 %1410 }
 0x7c5   : > { %v1420_v3 = vmul.f32 1.442695, %v1414_v1  ;;  %v1415_v5 = vsub.f32 %v1399_v42, %v1411_v2  ;;  %v2229_v1 = vld [vmem:[%s2759_s6 + $0x10] sm:$0xff]   ;;  %v2230_v2 = vld [vmem:[%s2759_s6 + $0x18] sm:$0xff]  }
 0x7c6   : > { %v1064_v8 = vpop.xlane.xlu0 %1063 }
 0x7c7   : > { %2277 = vpow2.f32 %v1420_v3  ;;  %v1422_v10 = vmul.f32 1.442695, %v1415_v5  ;;  %v2231_v3 = vld [vmem:[%s2759_s6 + $0x20] sm:$0xff]   ;;  %v2232_v5 = vld [vmem:[%s2759_s6 + $0x28] sm:$0xff]  }
 0x7c8   : > { %2279 = vrcp.f32 %v1064_v8  ;;  %v1067_v11 = vpop.xlane.xlu1 %1066  ;;  %v2233_v8 = vld [vmem:[%s2759_s6 + $0x30] sm:$0xff]  }
 0x7c9   : > { %2281 = vpow2.f32 %v1422_v10 }
 0x7ca   : > { %2283 = vrcp.f32 %v1067_v11  ;;  %v1070_v40 = vpop.xlane.xlu0 %1069 }
 0x7cb   : > { %2285 = vpow2.f32 %v1418_v9 }
 0x7cc   : > { %v1073_v38 = vpop.xlane.xlu1 %1072 }
 0x7cd   : > { %v2276_v12 = vpop.eup %2275  ;;  %2287 = vrcp.f32 %v1073_v38 }
 0x7ce   : > { %v1424_v32 = vsel %vm794_vm0, %v2276_v12, 0.0  ;;  %2289 = vrcp.f32 %v1070_v40 }
 0x7d0   : > { %v1089_v39 = vpop.permute.xlu1 %1088 }
 0x7d1   : > { %v2278_v18 = vpop.eup %2277 }
 0x7d2   : > { %v2280_v20 = vpop.eup %2279  ;;  %v1430_v21 = vsel %vm794_vm0, %v2278_v18, 0.0 }
 0x7d3   : > { %v2282_v23 = vpop.eup %2281  ;;  %1431 = vadd.xlane.f32.xlu0 %v1430_v21  ;;  %v1078_v29 = vmul.f32 %v2280_v20, %v2268_v31 }
 0x7d4   : > { %v2284_v24 = vpop.eup %2283  ;;  %v1433_v25 = vsel %vm794_vm0, %v2282_v23, 0.0  ;;  %v1447_v43 = vpop.permute.xlu1 %1446 }
 0x7d5   : > { %v2286_v26 = vpop.eup %2285  ;;  %1434 = vadd.xlane.f32.xlu1 %v1433_v25  ;;  %v1079_v30 = vmul.f32 %v2284_v24, %v2270_v48 }
 0x7d6   : > { %v1427_v37 = vsel %vm794_vm0, %v2286_v26, 0.0 }
 0x7d7   : > { %1425 = vadd.xlane.f32.xlu0 %v1424_v32  ;;  %v1082_v33 = vpack.c.bf16 %v1079_v30, %v1078_v29  ;;  %v2288_v44 = vpop.eup %2287 }
 0x7d9   : > { %2081 = vmatprep.mubr.msk.bf16.mxu0 %vm794_vm0, %v1082_v33  ;;  %1428 = vadd.xlane.f32.xlu1 %v1427_v37 }
 0x7ea   : > { %1448 = vrot.lane.b32.xlu1 %v2522_v35, %s2318_s26  ;;  %v2290_v35 = vpop.eup %2289 }
 0x7eb   : > { %v1080_v31 = vmul.f32 %v2290_v35, %v2649_v50 }
 0x7ed   : > { %1086 = vrot.lane.b32.xlu0 %v2524_v36, %s2316_s23  ;;  %v1081_v36 = vmul.f32 %v2288_v44, %v2652_v52 }
 0x7ef   : > { %v1083_v48 = vpack.c.bf16 %v1081_v36, %v1080_v31 }
 0x860   : > { %v1432_v45 = vpop.xlane.xlu0 %1431 }
 0x862   : > { %v1435_v41 = vpop.xlane.xlu1 %1434 }
 0x864   : > { %v1426_v34 = vpop.xlane.xlu0 %1425 }
 0x865   : > { %2291 = vrcp.f32 %v1426_v34 }
 0x866   : > { %2293 = vrcp.f32 %v1435_v41  ;;  %v1429_v42 = vpop.xlane.xlu1 %1428 }
 0x867   : > { %2295 = vrcp.f32 %v1429_v42 }
 0x868   : > { %2297 = vrcp.f32 %v1432_v45  ;;  %v1087_v47 = vpop.permute.xlu0 %1086 }
 0x869   : > { %2077 = vmatprep.subr.bf16.mxu0 %v1087_v47 }
 0x86a   : > { %2078 = vmatpush3.bf16.msra.mxu0 %v1087_v47  ;;  %v1449_v54 = vpop.permute.xlu1 %1448 }
 0x86b   : > { %2079 = vmatprep.subr.bf16.mxu0 %v1089_v39 }
 0x86e   : > { %2080 = vmatpush3.bf16.msra.mxu0 %v1089_v39 }
 0x86f   : > { %v2292_v46 = vpop.eup %2291  ;;  %2109 = vmatprep.subr.bf16.mxu0 %v1447_v43 }
 0x870   : > { %v2294_v49 = vpop.eup %2293  ;;  %v1440_v59 = vmul.f32 %v2292_v46, %v2276_v12  ;;  %v2234_v12 = vld [vmem:[%s2759_s6 + $0x38] sm:$0xff]  }
 0x871   : > { %v2296_v51 = vpop.eup %2295  ;;  %2082 = vmatmul.mubr.msk.bf16.vlgmr.msra.gmra.mrb[8].mxu0 %vm794_vm0, %v1083_v48  ;;  %v1443_v61 = vmul.f32 %v2294_v49, %v2282_v23 }
 0x872   : > { %v2298_v53 = vpop.eup %2297  ;;  %2110 = vmatpush3.bf16.msra.mxu0 %v1447_v43  ;;  %v1441_v60 = vmul.f32 %v2296_v51, %v2286_v26 }
 0x873   : > { %2111 = vmatprep.subr.bf16.mxu0 %v1449_v54  ;;  %v1442_v52 = vmul.f32 %v2298_v53, %v2278_v18 }
 0x874   : > { %v1444_v62 = vpack.c.bf16 %v1441_v60, %v1440_v59  ;;  %v1899_v59 = vld [vmem:[%s2760_s7] ss:$0 sm:$0xff] }
 0x875   : > { %v1445_v50 = vpack.c.bf16 %v1443_v61, %v1442_v52 }
 0x876   : > { %2112 = vmatpush3.bf16.msra.mxu0 %v1449_v54  ;;  %2113 = vmatprep.mubr.msk.bf16.mxu0 %vm794_vm0, %v1444_v62 }
 0x877   : > { %2117 = vmatprep.subr.bf16.mxu0 %v2227_v63 }
 0x879   : > { %2114 = vmatmul.mubr.msk.bf16.vlgmr.msra.gmra.mrb[12].mxu0 %vm794_vm0, %v1445_v50 }
 0x87a   : > { %2118 = vmatpush3.bf16.msra.mxu0 %v2227_v63 }
 0x87b   : > { %2119 = vmatprep.subr.bf16.mxu0 %v2228_v0 }
 0x87e   : > { %2120 = vmatpush3.bf16.msra.mxu0 %v2228_v0 }
 0x87f   : > { %2121 = vmatprep.subr.bf16.mxu0 %v2229_v1 }
 0x882   : > { %2122 = vmatpush3.bf16.msra.mxu0 %v2229_v1 }
 0x883   : > { %2123 = vmatprep.subr.bf16.mxu0 %v2230_v2 }
 0x886   : > { %2124 = vmatpush3.bf16.msra.mxu0 %v2230_v2 }
 0x887   : > { %2125 = vmatprep.subr.bf16.mxu0 %v2231_v3 }
 0x88a   : > { %2126 = vmatpush3.bf16.msra.mxu0 %v2231_v3 }
 0x88b   : > { %2127 = vmatprep.subr.bf16.mxu0 %v2232_v5 }
 0x88e   : > { %2128 = vmatpush3.bf16.msra.mxu0 %v2232_v5 }
 0x88f   : > { %2129 = vmatprep.subr.bf16.mxu0 %v2233_v8 }
 0x892   : > { %2130 = vmatpush3.bf16.msra.mxu0 %v2233_v8 }
 0x893   : > { %2131 = vmatprep.subr.bf16.mxu0 %v2234_v12 }
 0x896   : > { %2132 = vmatpush3.bf16.msra.mxu0 %v2234_v12 }
 0x944   : > { %v2083_v9 = vpop.f32.mrb[8].mxu0 }
 0x945   : > { %v1132_v10 = vpop.f32.mrb[9].mxu0 }
 0x946   : > { %v2084_v11 = vpop.f32.mrb[10].mxu0 }
 0x947   : > { %v2162_v18 = vpack.i.bf16 %v2084_v11, %v2083_v9  ;;  %v1135_v20 = vpop.f32.mrb[11].mxu0 }
 0x948   : > { %v2157_v21 = vpack.i.bf16 %v1135_v20, %v1132_v10 }
 0x949   : > { %2163 = vrot.lane.b32.xlu1 %v2162_v18, %s2318_s26 }
 0x94a   : > { %2158 = vrot.lane.b32.xlu0 %v2157_v21, %s2318_s26 }
 0x94c   : > { %v2115_v23 = vpop.f32.mrb[12].mxu0 }
 0x94d   : > { %2173 = vrot.lane.b32.xlu1 %v2172_v16, %s2317_s25  ;;  %v1492_v24 = vpop.f32.mrb[13].mxu0 }
 0x94e   : > { %2168 = vrot.lane.b32.xlu0 %v2167_v19, %s2317_s25  ;;  %v2116_v25 = vpop.f32.mrb[14].mxu0 }
 0x94f   : > { %v2182_v26 = vpack.i.bf16 %v2116_v25, %v2115_v23  ;;  %v1495_v29 = vpop.f32.mrb[15].mxu0 }
 0x950   : > { %v2177_v30 = vpack.i.bf16 %v1495_v29, %v1492_v24 }
 0x951   : > { %2183 = vrot.lane.b32.xlu1 %v2182_v26, %s2316_s23 }
 0x952   : > { %2178 = vrot.lane.b32.xlu0 %v2177_v30, %s2316_s23 }
 0x9bb   : > { %v2164_v32 = vpop.permute.xlu1 %2163 }
 0x9bc   : > { %v2159_v33 = vpop.permute.xlu0 %2158  ;;  %v2166_v37 = vunpack.i.h.bf16 %v2164_v32  ;;  %v2165_v38 = vunpack.i.l.bf16 %v2164_v32 }
 0x9bd   : > { %v2161_v15 = vunpack.i.h.bf16 %v2159_v33  ;;  %v2160_v16 = vunpack.i.l.bf16 %v2159_v33 }
 0x9be   : > { %v1558_v19 = vsel %vm794_vm0, %v2588_v57, %v2166_v37  ;;  %v1557_v45 = vsel %vm794_vm0, %v2584_v55, %v2165_v38 }
 0x9bf   : > { %v2174_v13 = vpop.permute.xlu1 %2173  ;;  %v1556_v34 = vsel %vm794_vm0, %v2590_v58, %v2161_v15  ;;  %v1555_v42 = vsel %vm794_vm0, %v2586_v56, %v2160_v16 }
 0x9c0   : > { %v2169_v39 = vpop.permute.xlu0 %2168  ;;  %v2176_v40 = vunpack.i.h.bf16 %v2174_v13  ;;  %v2175_v43 = vunpack.i.l.bf16 %v2174_v13 }
 0x9c1   : > { %v2171_v14 = vunpack.i.h.bf16 %v2169_v39  ;;  %v2170_v17 = vunpack.i.l.bf16 %v2169_v39 }
 0x9c2   : > { %v1562_v36 = vsel %vm1559_vm1, %v1557_v45, %v2175_v43  ;;  %v1563_v31 = vsel %vm1559_vm1, %v1558_v19, %v2176_v40 }
 0x9c3   : > { %v2184_v41 = vpop.permute.xlu1 %2183  ;;  %v1560_v48 = vsel %vm1559_vm1, %v1555_v42, %v2170_v17  ;;  %v1561_v55 = vsel %vm1559_vm1, %v1556_v34, %v2171_v14 }
 0x9c4   : > { %v2186_v44 = vunpack.i.h.bf16 %v2184_v41  ;;  %v2185_v47 = vunpack.i.l.bf16 %v2184_v41  ;;  %v2179_v35 = vpop.permute.xlu0 %2178  ;;  %v1908_v41 = vld [vmem:[%s2761_s8] ss:$0 sm:$0xff] }
 0x9c5   : > { %v2181_v46 = vunpack.i.h.bf16 %v2179_v35  ;;  %v2180_v57 = vunpack.i.l.bf16 %v2179_v35 }
 0x9c6   : > { %v1567_v49 = vsel %vm1564_vm2, %v1562_v36, %v2185_v47  ;;  %v1568_v58 = vsel %vm1564_vm2, %v1563_v31, %v2186_v44  ;;  %v1909_v36 = vld [vmem:[%s2762_s9] ss:$0 sm:$0xff] }
 0x9c7   : > { %v1570_v51 = vpack.c.bf16 %v1568_v58, %v1567_v49  ;;  %v1565_v56 = vsel %vm1564_vm2, %v1560_v48, %v2180_v57  ;;  %v1566_v53 = vsel %vm1564_vm2, %v1561_v55, %v2181_v46 }
 0x9c8   : > { %v1569_v54 = vpack.c.bf16 %v1566_v53, %v1565_v56 }
 0x9ca   : > { %2133 = vmatprep.mubr.bf16.mxu0 %v1569_v54 }
 0x9cb   : > { %2134 = vmatmul.mubr.bf16.vlgmr.msra.gmra.mrb[16].mxu0 %v1570_v51 }
 0xa9e   : > { %v2135_v60 = vpop.f32.mrb[16].mxu0 }
 0xa9f   : > { %v1676_v61 = vpop.f32.mrb[17].mxu0  ;;  %v1685_v62 = vadd.f32 %v2135_v60, %v1899_v59 }
 0xaa0   : > { %v1677_v52 = vadd.f32 %v1899_v59, %v1676_v61  ;;  %v2136_v50 = vpop.f32.mrb[18].mxu0 }
 0xaa1   : > { %v1679_v63 = vpop.f32.mrb[19].mxu0  ;;  %v1693_v2 = vmax.f32 %v1685_v62, 0.0  ;;  %v1688_v3 = vadd.f32 %v2136_v50, %v1899_v59 }
 0xaa2   : > { %v1691_v0 = vmax.f32 %v1677_v52, 0.0  ;;  %v1680_v1 = vadd.f32 %v1899_v59, %v1679_v63 }
 0xaa3   : > { %v1694_v10 = vmax.f32 %v1688_v3, 0.0  ;;  %v1697_v11 = vadd.f32 %v1928_v27, %v1693_v2 }
 0xaa4   : > { %v1692_v5 = vmax.f32 %v1680_v1, 0.0  ;;  %v1695_v8 = vadd.f32 %v1924_v6, %v1691_v0 }
 0xaa5   : > { %v1698_v12 = vadd.f32 %v1929_v28, %v1694_v10 }
 0xaa6   : > { %1699 = vadd.xlane.f32.xlu0 %v1695_v8  ;;  %v1696_v9 = vadd.f32 %v1925_v7, %v1692_v5 }
 0xaa8   : > { %1701 = vadd.xlane.f32.xlu1 %v1696_v9 }
 0xaaa   : > { %1703 = vadd.xlane.f32.xlu0 %v1697_v11 }
 0xaae   : > { %1705 = vadd.xlane.f32.xlu0 %v1698_v12 }
 0xb33   : > { %v1700_v18 = vpop.xlane.xlu0 %1699 }
 0xb34   : > { %v1708_v20 = vmul.f32 0.0078125, %v1700_v18 }
 0xb35   : > { %v1702_v21 = vpop.xlane.xlu1 %1701 }
 0xb36   : > { %v1712_v23 = vsub.f32 %v1695_v8, %v1708_v20  ;;  %v1709_v24 = vmul.f32 0.0078125, %v1702_v21 }
 0xb37   : > { %v1704_v6 = vpop.xlane.xlu0 %1703 }
 0xb38   : > { %v1713_v25 = vsub.f32 %v1696_v9, %v1709_v24  ;;  %v1710_v26 = vmul.f32 0.0078125, %v1704_v6  ;;  %v1716_v4 = vmul.f32 %v1712_v23, %v1712_v23 }
 0xb3a   : > { %v1714_v7 = vsub.f32 %v1697_v11, %v1710_v26  ;;  %1720 = vadd.xlane.f32.xlu0 %v1716_v4  ;;  %v1717_v29 = vmul.f32 %v1713_v25, %v1713_v25 }
 0xb3b   : > { %v1706_v30 = vpop.xlane.xlu0 %1705 }
 0xb3c   : > { %v1711_v32 = vmul.f32 0.0078125, %v1706_v30  ;;  %1722 = vadd.xlane.f32.xlu1 %v1717_v29  ;;  %v1718_v27 = vmul.f32 %v1714_v7, %v1714_v7 }
 0xb3e   : > { %v1715_v33 = vsub.f32 %v1698_v12, %v1711_v32  ;;  %1724 = vadd.xlane.f32.xlu0 %v1718_v27 }
 0xb40   : > { %v1719_v22 = vmul.f32 %v1715_v33, %v1715_v33 }
 0xb42   : > { %1726 = vadd.xlane.f32.xlu1 %v1719_v22 }
 0xbc7   : > { %v1721_v28 = vpop.xlane.xlu0 %1720 }
 0xbc8   : > { %v1728_v37 = vmul.f32 0.0078125, %v1721_v28 }
 0xbc9   : > { %v1723_v38 = vpop.xlane.xlu1 %1722 }
 0xbca   : > { %v1732_v13 = vadd.f32 1e-05, %v1728_v37  ;;  %v1729_v15 = vmul.f32 0.0078125, %v1723_v38 }
 0xbcb   : > { %v1725_v16 = vpop.xlane.xlu0 %1724 }
 0xbcc   : > { %2299 = vrsqrt.f32 %v1732_v13  ;;  %v1733_v39 = vadd.f32 1e-05, %v1729_v15  ;;  %v1730_v40 = vmul.f32 0.0078125, %v1725_v16 }
 0xbce   : > { %2301 = vrsqrt.f32 %v1733_v39  ;;  %v1734_v43 = vadd.f32 1e-05, %v1730_v40 }
 0xbcf   : > { %v1727_v14 = vpop.xlane.xlu1 %1726 }
 0xbd0   : > { %2303 = vrsqrt.f32 %v1734_v43  ;;  %v1731_v17 = vmul.f32 0.0078125, %v1727_v14 }
 0xbd2   : > { %v1735_v19 = vadd.f32 1e-05, %v1731_v17 }
 0xbd4   : > { %2305 = vrsqrt.f32 %v1735_v19 }
 0xbd6   : > { %v2300_v45 = vpop.eup %2299 }
 0xbd7   : > { %v1740_v34 = vmul.f32 %v2300_v45, %v1712_v23 }
 0xbd8   : > { %v2302_v42 = vpop.eup %2301 }
 0xbd9   : > { %v1751_v44 = vmul.f32 %v1908_v41, %v1740_v34  ;;  %v1741_v47 = vmul.f32 %v2302_v42, %v1713_v25 }
 0xbda   : > { %v2304_v35 = vpop.eup %2303 }
 0xbdb   : > { %v1752_v31 = vmul.f32 %v1908_v41, %v1741_v47  ;;  %v1742_v46 = vmul.f32 %v2304_v35, %v1714_v7  ;;  %v1762_v57 = vadd.f32 %v1909_v36, %v1751_v44 }
 0xbdd   : > { %v1763_v48 = vadd.f32 %v1909_v36, %v1752_v31  ;;  %v1753_v58 = vmul.f32 %v1908_v41, %v1742_v46 }
 0xbde   : > { %v2306_v55 = vpop.eup %2305 }
 0xbdf   : > { %v1941_v49 = vpack.c.bf16 %v1763_v48, %v1762_v57  ;;  %v1743_v51 = vmul.f32 %v2306_v55, %v1715_v33  ;;  %v1764_v53 = vadd.f32 %v1909_v36, %v1753_v58 }
 0xbe1   : > { %1942 = vst [vmem:[%s359_s16] sm:$0xff] %v1941_v49   ;;  %v1754_v56 = vmul.f32 %v1908_v41, %v1743_v51 }
 0xbe3   : > { %v1765_v54 = vadd.f32 %v1909_v36, %v1754_v56 }
 0xbe5   : > { %v1946_v59 = vpack.c.bf16 %v1765_v54, %v1764_v53 }
 0xbe7   : > { %1950 = vst [vmem:[%s359_s16 + $0x8] sm:$0xff] %v1946_v59  }
 0xbe8 PF: > { %s20_s13 = sadd.s32 1, %s2313_s13  }
 0xbe9   : > { %p17_p4 = scmp.ge.s32.totalorder %s20_s13, 4  }
 0xbeb   :  { %19 = sbr.rel (!%p17_p4) target bundleno = 1 (0x1), region = 90 }

</bundles_post_ra>
